<compile_context>
chip_gen: v5e
topology: v5e:2x2
jax: 0.10.0
libtpu: 0.0.40
codegen_flags: <defaults>
</compile_context>

<pallas_src>
import functools

import jax
import jax.numpy as jnp
from jax import lax
from jax.experimental import pallas as pl
from jax.experimental.pallas import tpu as pltpu

_NEG = -1e9  # mask value for padded class columns (softmax prob underflows to 0)


def _round_up(n, m):
    return ((n + m - 1) // m) * m


def _vat_tile_kernel(logit_ref, d0_ref, w_ref, wt_ref, out_ref, *,
                     n_power, xi, epsilon, inv_batch):
    logit = logit_ref[...]                       # (TB, Kp) f32
    d = d0_ref[...].astype(jnp.float32)          # (TB, Dp) bf16 stream -> f32 math
    w = w_ref[...]                               # (Dp, Kp) bf16 (resident)
    wt = wt_ref[...]                             # (Kp, Dp) bf16 (resident, pre-transposed)

    def row_scale(v):
        # Fused torch.get_normalized_vector: normalize(v) == v * row_scale(v).
        # One rsqrt (EUP) + one full-width multiply instead of two divides.
        inv_amax = 1.0 / (1e-12 + jnp.max(jnp.abs(v), axis=1, keepdims=True))
        ss = jnp.sum(v * v, axis=1, keepdims=True)
        return inv_amax * lax.rsqrt(1e-6 + (inv_amax * inv_amax) * ss)

    def softmax(z):
        z = z - jnp.max(z, axis=1, keepdims=True)
        e = jnp.exp(z)
        return e / jnp.sum(e, axis=1, keepdims=True)

    def log_softmax(z):
        z = z - jnp.max(z, axis=1, keepdims=True)
        return z - jnp.log(jnp.sum(jnp.exp(z), axis=1, keepdims=True))

    def perturbed_logits(p):
        # model(x + p) = logit + p @ W  (linear model; bias cancels).  bf16 MXU
        # operands, f32 accumulation.
        return logit + jnp.dot(p.astype(jnp.bfloat16), w,
                               preferred_element_type=jnp.float32)

    q = softmax(logit)                           # fixed target distribution

    # Power iteration (n_power is a small static hyperparameter -> unrolled).
    # TODO(synk): switch to lax.fori_loop(unroll=...) if n_power grows beyond ~2.
    for _ in range(n_power):
        dn = (xi * row_scale(d)) * d                         # xi * normalize(d)
        p_m = softmax(perturbed_logits(dn))
        g = (p_m - q) * inv_batch                            # dKL/dlogit_m (analytic autograd)
        d = jnp.dot(g.astype(jnp.bfloat16), wt,              # @ W^T, no in-kernel transpose
                    preferred_element_type=jnp.float32)

    r_vadv = (epsilon * row_scale(d)) * d                    # epsilon * normalize(d)
    logit_m = perturbed_logits(r_vadv)

    # Per-(example, class) KL contributions: q * (log_softmax(logit) - log_softmax(logit_m)).
    # Padded rows / padded class columns contribute exactly 0.  Lane-dense store.
    out_ref[...] = q * (log_softmax(logit) - log_softmax(logit_m))


def vat_loss_pallas(logit, w, d0_flat, *, n_power, xi, epsilon, batch_tile=128):
    """VAT loss for a linear classifier, computed by a tiled Pallas TPU kernel."""
    bsz, k = logit.shape
    d_dim = d0_flat.shape[1]
    assert w.shape == (d_dim, k)

    kp = _round_up(k, 128)                    # lane-dense class axis
    dp = _round_up(d_dim, 128)
    tb = min(batch_tile, _round_up(bsz, 8))   # batch tile, sublane aligned
    bp = _round_up(bsz, tb)
    ntiles = bp // tb

    # Padding: extra class columns masked with a large negative logit + zero W
    # columns; extra batch rows get zero d0 (=> exactly zero loss contribution).
    logit_p = jnp.full((bp, kp), _NEG, jnp.float32).at[:bsz, :k].set(
        logit.astype(jnp.float32))
    d0_p = jnp.zeros((bp, dp), jnp.bfloat16).at[:bsz, :d_dim].set(
        d0_flat.astype(jnp.bfloat16))
    w_p = jnp.zeros((dp, kp), jnp.bfloat16).at[:d_dim, :k].set(
        w.astype(jnp.bfloat16))
    wt_p = w_p.T                              # pre-transposed W for the d-update

    kernel = functools.partial(_vat_tile_kernel, n_power=int(n_power),
                               xi=float(xi), epsilon=float(epsilon),
                               inv_batch=1.0 / float(bsz))

    out = pl.pallas_call(
        kernel,
        grid=(ntiles,),
        in_specs=[
            pl.BlockSpec((tb, kp), lambda i: (i, 0)),   # logit tile   (pipelined)
            pl.BlockSpec((tb, dp), lambda i: (i, 0)),   # d0 tile      (pipelined, bf16)
            pl.BlockSpec((dp, kp), lambda i: (0, 0)),   # W            (resident)
            pl.BlockSpec((kp, dp), lambda i: (0, 0)),   # W^T          (resident)
        ],
        out_specs=pl.BlockSpec((tb, kp), lambda i: (i, 0)),
        out_shape=jax.ShapeDtypeStruct((bp, kp), jnp.float32),
        compiler_params=pltpu.CompilerParams(
            dimension_semantics=("parallel",),          # batch tiles independent (v7x 2-TC)
            vmem_limit_bytes=32 * 1024 * 1024),         # safe on v5e/v6e/v7x
    )(logit_p, d0_p, w_p, wt_p)

    # Tiny final reduction in JAX: mean over real batch of per-example KL.
    return jnp.sum(out[:bsz, :k]) / bsz


def vat_loss_ref(logit, w, d0_flat, *, n_power, xi, epsilon):
    """Pure-JAX reference mirroring the kernel math (same bf16 matmul operands)."""
    bsz = logit.shape[0]
    logit = logit.astype(jnp.float32)
    w_bf = w.astype(jnp.bfloat16)
    wt_bf = w_bf.T
    d = d0_flat.astype(jnp.bfloat16).astype(jnp.float32)

    def row_scale(v):
        inv_amax = 1.0 / (1e-12 + jnp.max(jnp.abs(v), axis=1, keepdims=True))
        ss = jnp.sum(v * v, axis=1, keepdims=True)
        return inv_amax * lax.rsqrt(1e-6 + (inv_amax * inv_amax) * ss)

    def softmax(z):
        z = z - jnp.max(z, axis=1, keepdims=True)
        e = jnp.exp(z)
        return e / jnp.sum(e, axis=1, keepdims=True)

    def log_softmax(z):
        z = z - jnp.max(z, axis=1, keepdims=True)
        return z - jnp.log(jnp.sum(jnp.exp(z), axis=1, keepdims=True))

    def perturbed_logits(p):
        return logit + jnp.dot(p.astype(jnp.bfloat16), w_bf,
                               preferred_element_type=jnp.float32)

    q = softmax(logit)
    for _ in range(n_power):
        dn = (xi * row_scale(d)) * d
        g = (softmax(perturbed_logits(dn)) - q) / bsz
        d = jnp.dot(g.astype(jnp.bfloat16), wt_bf,
                    preferred_element_type=jnp.float32)
    r_vadv = (epsilon * row_scale(d)) * d
    logit_m = perturbed_logits(r_vadv)
    return jnp.sum(q * (log_softmax(logit) - log_softmax(logit_m))) / bsz


if __name__ == "__main__":
    # VAT hyperparameters (params.n_power, params.XI, params.epsilon).
    # NOTE: the demo uses XI=1e-1 (not the paper's 1e-6) so that the power-iteration
    # gradient softmax(logit + xi*dn@W) - softmax(logit) is resolvable in float32.
    # At xi=1e-6 that difference sits below f32 rounding, so the resulting direction
    # is numerical noise in ANY framework (including the PyTorch original) and a
    # kernel-vs-reference comparison is meaningless.
    N_POWER, XI, EPSILON = 1, 1e-1, 2.0

    B, C, H, W = 2, 4, 16, 16          # input shape (NCHW)
    K = 10                             # number of classes
    D = C * H * W

    key = jax.random.PRNGKey(0)
    kx, kw, kb, kd = jax.random.split(key, 4)

    x = jax.random.normal(kx, (B, C, H, W), dtype=jnp.float32)
    w = 0.02 * jax.random.normal(kw, (D, K), dtype=jnp.float32)
    b = 0.01 * jax.random.normal(kb, (K,), dtype=jnp.float32)
    d0 = jax.random.normal(kd, (B, C, H, W), dtype=jnp.float32)   # randn_like(x)

    # logit produced by the (synthetic linear) model, as passed to VAT.forward.
    logit = x.reshape(B, -1) @ w + b[None, :]
    d0_flat = d0.reshape(B, -1)

    loss = vat_loss_pallas(logit, w, d0_flat,
                           n_power=N_POWER, xi=XI, epsilon=EPSILON)
    loss = jax.block_until_ready(loss)

    loss_ref = vat_loss_ref(logit, w, d0_flat,
                            n_power=N_POWER, xi=XI, epsilon=EPSILON)

    assert jnp.isfinite(loss), loss
    assert jnp.allclose(loss, loss_ref, atol=2e-4, rtol=2e-2), (loss, loss_ref)

    print("KERNEL_OK")
</pallas_src>

<mosaic_0001>
module attributes {stable_mosaic.version = 11 : i64} {
  func.func @_vat_tile_kernel(%arg0: i32, %arg1: memref<8x128xf32, #tpu.memory_space<vmem>>, %arg2: memref<8x1024xbf16, #tpu.memory_space<vmem>>, %arg3: memref<1024x128xbf16, #tpu.memory_space<vmem>>, %arg4: memref<128x1024xbf16, #tpu.memory_space<vmem>>, %arg5: memref<8x128xf32, #tpu.memory_space<vmem>>) attributes {dimension_semantics = [#tpu.dimension_semantics<parallel>], iteration_bounds = array<i64: 1>, scalar_prefetch = 0 : i64, scratch_operands = 0 : i64, tpu.core_type = #tpu.core_type<tc>, window_params = [{transform_indices = @transform_0, window_bounds = array<i64: 8, 128>}, {transform_indices = @transform_1, window_bounds = array<i64: 8, 1024>}, {pipeline_mode = #tpu.pipeline_mode<synchronous>, transform_indices = @transform_2, window_bounds = array<i64: 1024, 128>}, {pipeline_mode = #tpu.pipeline_mode<synchronous>, transform_indices = @transform_3, window_bounds = array<i64: 128, 1024>}, {transform_indices = @transform_4, window_bounds = array<i64: 8, 128>}]} {
    %c0 = arith.constant 0 : index
    %c0_0 = arith.constant 0 : index
    %0 = vector.load %arg1[%c0, %c0_0] : memref<8x128xf32, #tpu.memory_space<vmem>>, vector<8x128xf32>
    %c0_1 = arith.constant 0 : index
    %c0_2 = arith.constant 0 : index
    %1 = vector.load %arg2[%c0_1, %c0_2] : memref<8x1024xbf16, #tpu.memory_space<vmem>>, vector<8x1024xbf16>
    %2 = arith.extf %1 : vector<8x1024xbf16> to vector<8x1024xf32>
    %c0_3 = arith.constant 0 : index
    %c0_4 = arith.constant 0 : index
    %3 = vector.load %arg3[%c0_3, %c0_4] : memref<1024x128xbf16, #tpu.memory_space<vmem>>, vector<1024x128xbf16>
    %c0_5 = arith.constant 0 : index
    %c0_6 = arith.constant 0 : index
    %4 = vector.load %arg4[%c0_5, %c0_6] : memref<128x1024xbf16, #tpu.memory_space<vmem>>, vector<128x1024xbf16>
    %cst = arith.constant dense<0xFF800000> : vector<8xf32>
    %5 = vector.multi_reduction <maximumf>, %0, %cst [1] : vector<8x128xf32> to vector<8xf32>
    %6 = vector.shape_cast %5 : vector<8xf32> to vector<8x1xf32>
    %7 = vector.broadcast %6 : vector<8x1xf32> to vector<8x128xf32>
    %8 = arith.subf %0, %7 : vector<8x128xf32>
    %9 = math.exp %8 : vector<8x128xf32>
    %cst_7 = arith.constant dense<0.000000e+00> : vector<8xf32>
    %10 = vector.multi_reduction <add>, %9, %cst_7 [1] : vector<8x128xf32> to vector<8xf32>
    %11 = vector.shape_cast %10 : vector<8xf32> to vector<8x1xf32>
    %12 = vector.broadcast %11 : vector<8x1xf32> to vector<8x128xf32>
    %13 = arith.divf %9, %12 : vector<8x128xf32>
    %14 = math.absf %2 : vector<8x1024xf32>
    %cst_8 = arith.constant dense<0xFF800000> : vector<8xf32>
    %15 = vector.multi_reduction <maximumf>, %14, %cst_8 [1] : vector<8x1024xf32> to vector<8xf32>
    %16 = vector.shape_cast %15 : vector<8xf32> to vector<8x1xf32>
    %cst_9 = arith.constant 9.99999996E-13 : f32
    %17 = vector.broadcast %cst_9 : f32 to vector<8x1xf32>
    %18 = arith.addf %17, %16 : vector<8x1xf32>
    %cst_10 = arith.constant 1.000000e+00 : f32
    %19 = vector.broadcast %cst_10 : f32 to vector<8x1xf32>
    %20 = arith.divf %19, %18 : vector<8x1xf32>
    %21 = arith.mulf %2, %2 : vector<8x1024xf32>
    %cst_11 = arith.constant dense<0.000000e+00> : vector<8xf32>
    %22 = vector.multi_reduction <add>, %21, %cst_11 [1] : vector<8x1024xf32> to vector<8xf32>
    %23 = vector.shape_cast %22 : vector<8xf32> to vector<8x1xf32>
    %24 = arith.mulf %20, %20 : vector<8x1xf32>
    %25 = arith.mulf %24, %23 : vector<8x1xf32>
    %cst_12 = arith.constant 9.99999997E-7 : f32
    %26 = vector.broadcast %cst_12 : f32 to vector<8x1xf32>
    %27 = arith.addf %26, %25 : vector<8x1xf32>
    %28 = math.rsqrt %27 : vector<8x1xf32>
    %29 = arith.mulf %20, %28 : vector<8x1xf32>
    %cst_13 = arith.constant 1.000000e-01 : f32
    %30 = vector.broadcast %cst_13 : f32 to vector<8x1xf32>
    %31 = arith.mulf %30, %29 : vector<8x1xf32>
    %32 = vector.broadcast %31 : vector<8x1xf32> to vector<8x1024xf32>
    %33 = arith.mulf %32, %2 : vector<8x1024xf32>
    %34 = arith.truncf %33 : vector<8x1024xf32> to vector<8x1024xbf16>
    %cst_14 = arith.constant dense<0.000000e+00> : vector<8x128xf32>
    %35 = tpu.matmul %34, %3, %cst_14 {dimension_numbers = #tpu.dot_dimension_numbers<[1], [0], [0], [1], [0, 0, 1, 1], [], []>} : vector<8x1024xbf16>, vector<1024x128xbf16>, vector<8x128xf32> -> vector<8x128xf32>
    %36 = arith.addf %0, %35 : vector<8x128xf32>
    %cst_15 = arith.constant dense<0xFF800000> : vector<8xf32>
    %37 = vector.multi_reduction <maximumf>, %36, %cst_15 [1] : vector<8x128xf32> to vector<8xf32>
    %38 = vector.shape_cast %37 : vector<8xf32> to vector<8x1xf32>
    %39 = vector.broadcast %38 : vector<8x1xf32> to vector<8x128xf32>
    %40 = arith.subf %36, %39 : vector<8x128xf32>
    %41 = math.exp %40 : vector<8x128xf32>
    %cst_16 = arith.constant dense<0.000000e+00> : vector<8xf32>
    %42 = vector.multi_reduction <add>, %41, %cst_16 [1] : vector<8x128xf32> to vector<8xf32>
    %43 = vector.shape_cast %42 : vector<8xf32> to vector<8x1xf32>
    %44 = vector.broadcast %43 : vector<8x1xf32> to vector<8x128xf32>
    %45 = arith.divf %41, %44 : vector<8x128xf32>
    %46 = arith.subf %45, %13 : vector<8x128xf32>
    %cst_17 = arith.constant 5.000000e-01 : f32
    %47 = vector.broadcast %cst_17 : f32 to vector<8x128xf32>
    %48 = arith.mulf %46, %47 : vector<8x128xf32>
    %49 = arith.truncf %48 : vector<8x128xf32> to vector<8x128xbf16>
    %cst_18 = arith.constant dense<0.000000e+00> : vector<8x1024xf32>
    %50 = tpu.matmul %49, %4, %cst_18 {dimension_numbers = #tpu.dot_dimension_numbers<[1], [0], [0], [1], [0, 0, 1, 1], [], []>} : vector<8x128xbf16>, vector<128x1024xbf16>, vector<8x1024xf32> -> vector<8x1024xf32>
    %51 = math.absf %50 : vector<8x1024xf32>
    %cst_19 = arith.constant dense<0xFF800000> : vector<8xf32>
    %52 = vector.multi_reduction <maximumf>, %51, %cst_19 [1] : vector<8x1024xf32> to vector<8xf32>
    %53 = vector.shape_cast %52 : vector<8xf32> to vector<8x1xf32>
    %cst_20 = arith.constant 9.99999996E-13 : f32
    %54 = vector.broadcast %cst_20 : f32 to vector<8x1xf32>
    %55 = arith.addf %54, %53 : vector<8x1xf32>
    %cst_21 = arith.constant 1.000000e+00 : f32
    %56 = vector.broadcast %cst_21 : f32 to vector<8x1xf32>
    %57 = arith.divf %56, %55 : vector<8x1xf32>
    %58 = arith.mulf %50, %50 : vector<8x1024xf32>
    %cst_22 = arith.constant dense<0.000000e+00> : vector<8xf32>
    %59 = vector.multi_reduction <add>, %58, %cst_22 [1] : vector<8x1024xf32> to vector<8xf32>
    %60 = vector.shape_cast %59 : vector<8xf32> to vector<8x1xf32>
    %61 = arith.mulf %57, %57 : vector<8x1xf32>
    %62 = arith.mulf %61, %60 : vector<8x1xf32>
    %cst_23 = arith.constant 9.99999997E-7 : f32
    %63 = vector.broadcast %cst_23 : f32 to vector<8x1xf32>
    %64 = arith.addf %63, %62 : vector<8x1xf32>
    %65 = math.rsqrt %64 : vector<8x1xf32>
    %66 = arith.mulf %57, %65 : vector<8x1xf32>
    %cst_24 = arith.constant 2.000000e+00 : f32
    %67 = vector.broadcast %cst_24 : f32 to vector<8x1xf32>
    %68 = arith.mulf %67, %66 : vector<8x1xf32>
    %69 = vector.broadcast %68 : vector<8x1xf32> to vector<8x1024xf32>
    %70 = arith.mulf %69, %50 : vector<8x1024xf32>
    %71 = arith.truncf %70 : vector<8x1024xf32> to vector<8x1024xbf16>
    %cst_25 = arith.constant dense<0.000000e+00> : vector<8x128xf32>
    %72 = tpu.matmul %71, %3, %cst_25 {dimension_numbers = #tpu.dot_dimension_numbers<[1], [0], [0], [1], [0, 0, 1, 1], [], []>} : vector<8x1024xbf16>, vector<1024x128xbf16>, vector<8x128xf32> -> vector<8x128xf32>
    %73 = arith.addf %0, %72 : vector<8x128xf32>
    %cst_26 = arith.constant dense<0xFF800000> : vector<8xf32>
    %74 = vector.multi_reduction <maximumf>, %0, %cst_26 [1] : vector<8x128xf32> to vector<8xf32>
    %75 = vector.shape_cast %74 : vector<8xf32> to vector<8x1xf32>
    %76 = vector.broadcast %75 : vector<8x1xf32> to vector<8x128xf32>
    %77 = arith.subf %0, %76 : vector<8x128xf32>
    %78 = math.exp %77 : vector<8x128xf32>
    %cst_27 = arith.constant dense<0.000000e+00> : vector<8xf32>
    %79 = vector.multi_reduction <add>, %78, %cst_27 [1] : vector<8x128xf32> to vector<8xf32>
    %80 = vector.shape_cast %79 : vector<8xf32> to vector<8x1xf32>
    %81 = math.log %80 : vector<8x1xf32>
    %82 = vector.broadcast %81 : vector<8x1xf32> to vector<8x128xf32>
    %83 = arith.subf %77, %82 : vector<8x128xf32>
    %cst_28 = arith.constant dense<0xFF800000> : vector<8xf32>
    %84 = vector.multi_reduction <maximumf>, %73, %cst_28 [1] : vector<8x128xf32> to vector<8xf32>
    %85 = vector.shape_cast %84 : vector<8xf32> to vector<8x1xf32>
    %86 = vector.broadcast %85 : vector<8x1xf32> to vector<8x128xf32>
    %87 = arith.subf %73, %86 : vector<8x128xf32>
    %88 = math.exp %87 : vector<8x128xf32>
    %cst_29 = arith.constant dense<0.000000e+00> : vector<8xf32>
    %89 = vector.multi_reduction <add>, %88, %cst_29 [1] : vector<8x128xf32> to vector<8xf32>
    %90 = vector.shape_cast %89 : vector<8xf32> to vector<8x1xf32>
    %91 = math.log %90 : vector<8x1xf32>
    %92 = vector.broadcast %91 : vector<8x1xf32> to vector<8x128xf32>
    %93 = arith.subf %87, %92 : vector<8x128xf32>
    %94 = arith.subf %83, %93 : vector<8x128xf32>
    %95 = arith.mulf %13, %94 : vector<8x128xf32>
    %c0_30 = arith.constant 0 : index
    %c0_31 = arith.constant 0 : index
    %96 = vector.load %arg5[%c0_30, %c0_31] : memref<8x128xf32, #tpu.memory_space<vmem>>, vector<8x128xf32>
    tpu.vector_store %arg5[%c0_30, %c0_31], %95 {strides = array<i32>} : memref<8x128xf32, #tpu.memory_space<vmem>>, vector<8x128xf32>,
    return
  }
  func.func @transform_0(%arg0: i32) -> (i32, i32) {
    %c0_i32 = arith.constant 0 : i32
    %c0_i32_0 = arith.constant 0 : i32
    return %arg0, %c0_i32 : i32, i32
  }
  func.func @transform_1(%arg0: i32) -> (i32, i32) {
    %c0_i32 = arith.constant 0 : i32
    %c0_i32_0 = arith.constant 0 : i32
    return %arg0, %c0_i32 : i32, i32
  }
  func.func @transform_2(%arg0: i32) -> (i32, i32) {
    %c0_i32 = arith.constant 0 : i32
    %c0_i32_0 = arith.constant 0 : i32
    %c0_i32_1 = arith.constant 0 : i32
    return %c0_i32, %c0_i32_0 : i32, i32
  }
  func.func @transform_3(%arg0: i32) -> (i32, i32) {
    %c0_i32 = arith.constant 0 : i32
    %c0_i32_0 = arith.constant 0 : i32
    %c0_i32_1 = arith.constant 0 : i32
    return %c0_i32, %c0_i32_0 : i32, i32
  }
  func.func @transform_4(%arg0: i32) -> (i32, i32) {
    %c0_i32 = arith.constant 0 : i32
    %c0_i32_0 = arith.constant 0 : i32
    return %arg0, %c0_i32 : i32, i32
  }
}

</mosaic_0001>

<bundles_post_ra>
// kernel: tpu_custom_call.1
= control target key start
LH: loop header
LB: loop body
LE: loop exit
PB: predicated region body
PF: predicated region fallthrough
CT: control target
= control target key end

     0   :  { %9 = vsyncpa [#allocation3], 0  ;;  %s2752_s0 = inlined_call_operand.hbm [shape: f32[8,128], index: 0, kind: input, shape index: {}]   ;;  %s2753_s1 = inlined_call_operand.hbm [shape: bf16[8,1024], index: 1, kind: input, shape index: {}]   ;;  %s2754_s2 = inlined_call_operand.hbm [shape: bf16[1024,128], index: 2, kind: input, shape index: {}]   ;;  %s2755_s3 = inlined_call_operand.hbm [shape: bf16[128,1024], index: 3, kind: input, shape index: {}]   ;;  %s2756_s4 = inlined_call_operand.hbm [shape: f32[8,128], index: 4, kind: output, shape index: {}]  }
   0x1   :  { %10 = vsyncpa [#allocation6], 0 }
   0x2   :  { %11 = vsyncpa [#allocation9], 0  ;;  %s29_s17 = sshll.u32 %s2753_s1, 4  ;;  %s30_s17 = int_to_ptr.hbm [resolvable:$true] %s29_s17 }
   0x3   :  { %12 = vsyncpa [#allocation4], 0  ;;  %s2358_s18 = smov [#allocation5]   ;;  %s18_s22 = sshll.u32 %s2752_s0, 4  ;;  %s19_s22 = int_to_ptr.hbm [resolvable:$true] %s18_s22 }
   0x4   :  { %s31_s19 = sshll.u32 %s2358_s18, 4  ;;  %s2359_s23 = smov [#allocation2]   ;;  %s32_s19 = int_to_ptr.vmem [resolvable:$true] %s31_s19 }
   0x5   :  { %34 = dma.hbm_to_vmem [thread:$0]  %s30_s17, 512, %s32_s19, [#allocation6]  }
   0x6   :  { %s20_s24 = sshll.u32 %s2359_s23, 4  ;;  %s39_s27 = sshll.u32 %s2754_s2, 4  ;;  %s21_s24 = int_to_ptr.vmem [resolvable:$true] %s20_s24  ;;  %s40_s27 = int_to_ptr.hbm [resolvable:$true] %s39_s27 }
   0x7   :  { %23 = dma.hbm_to_vmem [thread:$0]  %s19_s22, 128, %s21_s24, [#allocation3]  }
   0x8   :  { %s2360_s1 = smov [#allocation7]   ;;  %s52_s5 = sshll.u32 %s2755_s3, 4  ;;  %s53_s5 = int_to_ptr.hbm [resolvable:$true] %s52_s5 }
   0x9   :  { %s41_s28 = sshll.u32 %s2360_s1, 4  ;;  %s2361_s6 = smov 64   ;;  %s42_s28 = int_to_ptr.vmem [resolvable:$true] %s41_s28 }
   0xa   :  { %s2362_s0 = smov 4   ;;  %s2363_s7 = smov [#allocation8]  }
   0xb   :  { %47 = dma.hbm_to_vmem [thread:$0]  %s40_s27, 8192, %s42_s28, [#allocation6], %s2361_s6, %s2361_s6, %s2362_s0  }
   0xc   :  { %s54_s8 = sshll.u32 %s2363_s7, 4  ;;  %s2364_s9 = smov 512   ;;  %s55_s8 = int_to_ptr.vmem [resolvable:$true] %s54_s8 }
   0xd   :  { %s2365_s10 = smov 32  }
   0xe   :  { %60 = dma.hbm_to_vmem [thread:$0]  %s53_s5, 8192, %s55_s8, [#allocation9], %s2364_s9, %s2364_s9, %s2365_s10  }
   0xf   :  { %2350 = dma.done.wait [#allocation3], 128  }
  0x10   :  { %2351 = vsyncadd [#allocation3], 4294967168 }
  0x11   :  { %2352 = dma.done.wait [#allocation6], 8704  }
  0x12   :  { %2353 = vsyncadd [#allocation6], 4294958592 }
  0x13   :  { %2354 = dma.done.wait [#allocation9], 8192  }
  0x14   :  { %2355 = vsyncadd [#allocation9], 4294959104  ;;  %v78_v0 = vld [vmem:[#allocation5] sm:$0xff]  ;;  %v79_v1 = vld [vmem:[#allocation5 + $0x8] sm:$0xff]  ;;  %s2366_s2 = smov [#allocation10]   ;;  %s1532_s13 = sshll.u32 %s2756_s4, 4  ;;  %s1533_s13 = int_to_ptr.hbm [resolvable:$true] %s1532_s13 }
  0x15   :  { %v80_v2 = vld [vmem:[#allocation5 + $0x10] sm:$0xff]  ;;  %v81_v3 = vld [vmem:[#allocation5 + $0x18] sm:$0xff]  ;;  %v2404_v4 = vunpack.c.l.bf16 %v78_v0  ;;  %v2406_v5 = vunpack.c.h.bf16 %v78_v0  ;;  %v2408_v6 = vunpack.c.l.bf16 %v79_v1  ;;  %v2410_v7 = vunpack.c.h.bf16 %v79_v1  ;;  %v2061_v50 = vld [vmem:[#allocation7 + $0x28] sm:$0xff]  ;;  %s1530_s3 = sshll.u32 %s2366_s2, 4  ;;  %s1531_s3 = int_to_ptr.vmem [resolvable:$true] %s1530_s3 }
  0x16   :  { %v2412_v8 = vunpack.c.l.bf16 %v80_v2  ;;  %v2414_v9 = vunpack.c.h.bf16 %v80_v2  ;;  %v2416_v10 = vunpack.c.l.bf16 %v81_v3  ;;  %v2418_v11 = vunpack.c.h.bf16 %v81_v3  ;;  %v2063_v42 = vld [vmem:[#allocation7 + $0x38] sm:$0xff]  ;;  %v2062_v46 = vld [vmem:[#allocation7 + $0x30] sm:$0xff]  ;;  %v2069_v51 = vld [vmem:[#allocation7 + $0x68] sm:$0xff] }
  0x17   :  { %v304_v12 = vand.u32 2147483647, %v2404_v4  ;;  %v305_v13 = vand.u32 2147483647, %v2406_v5  ;;  %v306_v14 = vand.u32 2147483647, %v2408_v6  ;;  %v337_v15 = vmul.f32 %v2404_v4, %v2404_v4  ;;  %769 = vmatpush.bf16.msra.mxu0 %v2063_v42 }
  0x18   :  { %v307_v16 = vand.u32 2147483647, %v2410_v7  ;;  %v308_v17 = vand.u32 2147483647, %v2412_v8  ;;  %v309_v18 = vand.u32 2147483647, %v2414_v9  ;;  %v338_v19 = vmul.f32 %v2406_v5, %v2406_v5 }
  0x19   :  { %v310_v20 = vand.u32 2147483647, %v2416_v10  ;;  %v311_v21 = vand.u32 2147483647, %v2418_v11  ;;  %v339_v24 = vmul.f32 %v2408_v6, %v2408_v6  ;;  %v340_v28 = vmul.f32 %v2410_v7, %v2410_v7  ;;  %v2071_v43 = vld [vmem:[#allocation7 + $0x78] sm:$0xff]  ;;  %v2070_v47 = vld [vmem:[#allocation7 + $0x70] sm:$0xff] }
  0x1a   :  { %v312_v22 = vmax.f32 %v304_v12, %v308_v17  ;;  %v313_v23 = vmax.f32 %v305_v13, %v309_v18  ;;  %v345_v29 = vadd.f32 %v338_v19, %v337_v15  ;;  %v341_v31 = vmul.f32 %v2412_v8, %v2412_v8  ;;  %v2079_v44 = vld [vmem:[#allocation7 + $0xb8] sm:$0xff]  ;;  %782 = vmatpush.bf16.msra.mxu1 %v2071_v43  ;;  %v2078_v48 = vld [vmem:[#allocation7 + $0xb0] sm:$0xff]  ;;  %v2077_v52 = vld [vmem:[#allocation7 + $0xa8] sm:$0xff] }
  0x1b   :  { %v314_v25 = vmax.f32 %v306_v14, %v310_v20  ;;  %v315_v26 = vmax.f32 %v307_v16, %v311_v21  ;;  %v342_v34 = vmul.f32 %v2414_v9, %v2414_v9  ;;  %v343_v36 = vmul.f32 %v2416_v10, %v2416_v10  ;;  %v2087_v45 = vld [vmem:[#allocation7 + $0xf8] sm:$0xff]  ;;  %795 = vmatpush.bf16.msra.mxu2 %v2079_v44  ;;  %v2086_v49 = vld [vmem:[#allocation7 + $0xf0] sm:$0xff]  ;;  %v2085_v53 = vld [vmem:[#allocation7 + $0xe8] sm:$0xff] }
  0x1c   :  { %v316_v27 = vmax.f32 %v312_v22, %v313_v23  ;;  %v346_v32 = vadd.f32 %v345_v29, %v339_v24  ;;  %v344_v38 = vmul.f32 %v2418_v11, %v2418_v11  ;;  %808 = vmatpush.bf16.msra.mxu3 %v2087_v45  ;;  %770 = vmatpush.bf16.msra.mxu0 %v2062_v46  ;;  %v2060_v54 = vld [vmem:[#allocation7 + $0x20] sm:$0xff]  ;;  %v2450_v58 = vld [vmem:[#allocation7 + $0x18] sm:$0xff]  ;;  %v2462_v62 = vld [vmem:[#allocation7 + $0x10] sm:$0xff] }
  0x1d   :  { %v317_v30 = vmax.f32 %v314_v25, %v315_v26  ;;  %v2068_v55 = vld [vmem:[#allocation7 + $0x60] sm:$0xff]  ;;  %v2452_v59 = vld [vmem:[#allocation7 + $0x58] sm:$0xff]  ;;  %v2464_v63 = vld [vmem:[#allocation7 + $0x50] sm:$0xff] }
  0x1e   :  { %v347_v35 = vadd.f32 %v346_v32, %v340_v28  ;;  %783 = vmatpush.bf16.msra.mxu1 %v2070_v47  ;;  %v2444_v56 = vld [vmem:[#allocation7 + $0xa0] sm:$0xff]  ;;  %v2454_v60 = vld [vmem:[#allocation7 + $0x98] sm:$0xff]  ;;  %v2466_v0 = vld [vmem:[#allocation7 + $0x90] sm:$0xff] }
  0x1f   :  { %v318_v33 = vmax.f32 %v316_v27, %v317_v30  ;;  %796 = vmatpush.bf16.msra.mxu2 %v2078_v48  ;;  %v2446_v57 = vld [vmem:[#allocation7 + $0xe0] sm:$0xff]  ;;  %v2456_v61 = vld [vmem:[#allocation7 + $0xd8] sm:$0xff]  ;;  %v2468_v1 = vld [vmem:[#allocation7 + $0xd0] sm:$0xff] }
  0x20   :  { %v348_v37 = vadd.f32 %v347_v35, %v341_v31  ;;  %809 = vmatpush.bf16.msra.mxu3 %v2086_v49  ;;  %771 = vmatpush.bf16.msra.mxu0 %v2061_v50  ;;  %v2474_v2 = vld [vmem:[#allocation7 + $0x8] sm:$0xff]  ;;  %v2486_v16 = vld [vmem:[#allocation7] sm:$0xff]  ;;  %v2494_v20 = vld [vmem:[#allocation7 + $0x138] sm:$0xff] }
  0x21   :  { %319 = vmax.xlane.f32.xlu0 %v318_v33  ;;  %v2476_v3 = vld [vmem:[#allocation7 + $0x48] sm:$0xff]  ;;  %v2488_v17 = vld [vmem:[#allocation7 + $0x40] sm:$0xff]  ;;  %v2496_v21 = vld [vmem:[#allocation7 + $0x178] sm:$0xff] }
  0x22   :  { %v349_v39 = vadd.f32 %v348_v37, %v342_v34  ;;  %784 = vmatpush.bf16.msra.mxu1 %v2069_v51  ;;  %v2478_v12 = vld [vmem:[#allocation7 + $0x88] sm:$0xff]  ;;  %v2490_v18 = vld [vmem:[#allocation7 + $0x80] sm:$0xff]  ;;  %v2500_v22 = vld [vmem:[#allocation7 + $0x1b8] sm:$0xff] }
  0x23   :  { %797 = vmatpush.bf16.msra.mxu2 %v2077_v52  ;;  %v2480_v13 = vld [vmem:[#allocation7 + $0xc8] sm:$0xff]  ;;  %v2492_v19 = vld [vmem:[#allocation7 + $0xc0] sm:$0xff]  ;;  %v2502_v23 = vld [vmem:[#allocation7 + $0x1f8] sm:$0xff] }
  0x24   :  { %v350_v40 = vadd.f32 %v349_v39, %v343_v36  ;;  %810 = vmatpush.bf16.msra.mxu3 %v2085_v53  ;;  %772 = vmatpush.bf16.msra.mxu0 %v2060_v54  ;;  %v2510_v24 = vld [vmem:[#allocation7 + $0x130] sm:$0xff]  ;;  %v2522_v30 = vld [vmem:[#allocation7 + $0x128] sm:$0xff]  ;;  %v2534_v39 = vld [vmem:[#allocation7 + $0x160] sm:$0xff] }
  0x25   :  { %v2512_v25 = vld [vmem:[#allocation7 + $0x170] sm:$0xff]  ;;  %v2524_v31 = vld [vmem:[#allocation7 + $0x168] sm:$0xff]  ;;  %v2546_v48 = vld [vmem:[#allocation7 + $0x118] sm:$0xff] }
  0x26   :  { %v351_v41 = vadd.f32 %v350_v40, %v344_v38  ;;  %785 = vmatpush.bf16.msra.mxu1 %v2068_v55  ;;  %v2514_v26 = vld [vmem:[#allocation7 + $0x1b0] sm:$0xff]  ;;  %v2526_v33 = vld [vmem:[#allocation7 + $0x1a8] sm:$0xff]  ;;  %v2532_v38 = vld [vmem:[#allocation7 + $0x120] sm:$0xff]  ;;  %2776 = vst [vmem:[#allocation16_spill] sm:$0xff] %v2546_v48 }
  0x27   :  { %798 = vmatpush.bf16.msra.mxu2 %v2444_v56  ;;  %v2516_v27 = vld [vmem:[#allocation7 + $0x1f0] sm:$0xff]  ;;  %v2528_v34 = vld [vmem:[#allocation7 + $0x1e8] sm:$0xff]  ;;  %v2538_v40 = vld [vmem:[#allocation7 + $0x1a0] sm:$0xff] }
  0x28   :  { %811 = vmatpush.bf16.msra.mxu3 %v2446_v57  ;;  %773 = vmatpush.bf16.msra.mxu0 %v2450_v58  ;;  %v2548_v49 = vld [vmem:[#allocation7 + $0x158] sm:$0xff]  ;;  %v2556_v53 = vld [vmem:[#allocation7 + $0x110] sm:$0xff] }
  0x29   :  { %352 = vadd.xlane.f32.xlu0 %v351_v41  ;;  %v2540_v41 = vld [vmem:[#allocation7 + $0x1e0] sm:$0xff]  ;;  %2777 = vst [vmem:[#allocation17_spill] sm:$0xff] %v2548_v49  ;;  %v2550_v50 = vld [vmem:[#allocation7 + $0x198] sm:$0xff]  ;;  %v2558_v54 = vld [vmem:[#allocation7 + $0x150] sm:$0xff] }
  0x2a   :  { %786 = vmatpush.bf16.msra.mxu1 %v2452_v59  ;;  %2775 = vst [vmem:[#allocation15_spill] sm:$0xff] %v2540_v41  ;;  %v2552_v51 = vld [vmem:[#allocation7 + $0x1d8] sm:$0xff]  ;;  %v2562_v55 = vld [vmem:[#allocation7 + $0x190] sm:$0xff] }
  0x2b   :  { %799 = vmatpush.bf16.msra.mxu2 %v2454_v60  ;;  %2778 = vst [vmem:[#allocation18_spill] sm:$0xff] %v2550_v50 }
  0x2c   :  { %812 = vmatpush.bf16.msra.mxu3 %v2456_v61  ;;  %774 = vmatpush.bf16.msra.mxu0 %v2462_v62  ;;  %2779 = vst [vmem:[#allocation19_spill] sm:$0xff] %v2552_v51 }
  0x2d   :  { %2780 = vst [vmem:[#allocation20_spill] sm:$0xff] %v2556_v53 }
  0x2e   :  { %787 = vmatpush.bf16.msra.mxu1 %v2464_v63  ;;  %2781 = vst [vmem:[#allocation21_spill] sm:$0xff] %v2558_v54 }
  0x2f   :  { %800 = vmatpush.bf16.msra.mxu2 %v2466_v0  ;;  %2782 = vst [vmem:[#allocation22_spill] sm:$0xff] %v2562_v55 }
  0x30   :  { %813 = vmatpush.bf16.msra.mxu3 %v2468_v1  ;;  %775 = vmatpush.bf16.msra.mxu0 %v2474_v2 }
  0x32   :  { %788 = vmatpush.bf16.msra.mxu1 %v2476_v3 }
  0x33   :  { %801 = vmatpush.bf16.msra.mxu2 %v2478_v12 }
  0x34   :  { %814 = vmatpush.bf16.msra.mxu3 %v2480_v13  ;;  %776 = vmatpush.bf16.msra.mxu0 %v2486_v16 }
  0x36   :  { %789 = vmatpush.bf16.msra.mxu1 %v2488_v17 }
  0x37   :  { %802 = vmatpush.bf16.msra.mxu2 %v2490_v18 }
  0x38   :  { %815 = vmatpush.bf16.msra.mxu3 %v2492_v19  ;;  %821 = vmatpush.bf16.msrb.mxu0 %v2494_v20 }
  0x3a   :  { %834 = vmatpush.bf16.msrb.mxu1 %v2496_v21 }
  0x3b   :  { %847 = vmatpush.bf16.msrb.mxu2 %v2500_v22 }
  0x3c   :  { %860 = vmatpush.bf16.msrb.mxu3 %v2502_v23  ;;  %822 = vmatpush.bf16.msrb.mxu0 %v2510_v24 }
  0x3e   :  { %835 = vmatpush.bf16.msrb.mxu1 %v2512_v25 }
  0x3f   :  { %848 = vmatpush.bf16.msrb.mxu2 %v2514_v26 }
  0x40   :  { %861 = vmatpush.bf16.msrb.mxu3 %v2516_v27  ;;  %823 = vmatpush.bf16.msrb.mxu0 %v2522_v30 }
  0x42   :  { %836 = vmatpush.bf16.msrb.mxu1 %v2524_v31 }
  0x43   :  { %849 = vmatpush.bf16.msrb.mxu2 %v2526_v33 }
  0x44   :  { %862 = vmatpush.bf16.msrb.mxu3 %v2528_v34  ;;  %824 = vmatpush.bf16.msrb.mxu0 %v2532_v38 }
  0x46   :  { %837 = vmatpush.bf16.msrb.mxu1 %v2534_v39 }
  0x47   :  { %850 = vmatpush.bf16.msrb.mxu2 %v2538_v40 }
  0x48   :  { %863 = vmatpush.bf16.msrb.mxu3 %v2540_v41  ;;  %825 = vmatpush.bf16.msrb.mxu0 %v2546_v48  ;;  %v2123_v48 = vld [vmem:[#allocation8 + $0x1c] sm:$0xf] }
  0x49   :  { %v1828_v41 = vld [vmem:[#allocation8 + $0x38] sm:$0xf0] }
  0x4a   :  { %838 = vmatpush.bf16.msrb.mxu1 %v2548_v49  ;;  %v2131_v49 = vld [vmem:[#allocation8 + $0x5c] sm:$0xf] }
  0x4b   :  { %851 = vmatpush.bf16.msrb.mxu2 %v2550_v50  ;;  %v2135_v50 = vld [vmem:[#allocation8 + $0x74] sm:$0xf0] }
  0x4c   :  { %864 = vmatpush.bf16.msrb.mxu3 %v2552_v51  ;;  %826 = vmatpush.bf16.msrb.mxu0 %v2556_v53 }
  0x4e   :  { %839 = vmatpush.bf16.msrb.mxu1 %v2558_v54 }
  0x4f   :  { %852 = vmatpush.bf16.msrb.mxu2 %v2562_v55 }
  0x94   :  { %v320_v14 = vpop.xlane.xlu0 %319 }
  0x95   :  { %v321_v15 = vadd.f32 1e-12, %v320_v14  ;;  %v2564_v14 = vld [vmem:[#allocation7 + $0x1d0] sm:$0xff] }
  0x96   :  { %2783 = vst [vmem:[#allocation23_spill] sm:$0xff] %v2564_v14  ;;  %865 = vmatpush.bf16.msrb.mxu3 %v2564_v14 }
  0x97   :  { %2193 = vrcp.f32 %v321_v15  ;;  %v333_v35 = vand.u32 2147483648, %v321_v15  ;;  %v331_v37 = vand.u32 2147483647, %v321_v15  ;;  %vm327_vm1 = vweird.f32 %v321_v15 }
  0x99   :  { %v334_v43 = vor.u32 1.1754944e-38, %v333_v35  ;;  %vm332_vm3 = vcmp.eq.f32.partialorder %v331_v37, 8.507059e+37  ;;  %v2577_v35 = vld [vmem:[#allocation7 + $0x188] sm:$0xff]  ;;  %v2583_v37 = vld [vmem:[#allocation7 + $0x100] sm:$0xff] }
  0x9a   :  { %2786 = vst [vmem:[#allocation26_spill] sm:$0xff] %v2577_v35  ;;  %853 = vmatpush.bf16.msrb.mxu2 %v2577_v35 }
  0x9b   :  { %2788 = vst [vmem:[#allocation28_spill] sm:$0xff] %v2583_v37 }
  0x9c   :  { %v353_v46 = vpop.xlane.xlu0 %352 }
  0x9d   :  { %v2194_v28 = vpop.eup %2193 }
  0x9e   :  { %v323_v29 = vmul.f32 %v2194_v28, %v321_v15  ;;  %vm328_vm0 = vweird.f32 %v2194_v28 }
  0x9f   :  { %vm329_vm2 = vmor %vm327_vm1, %vm328_vm0 }
  0xa0   :  { %v324_v32 = vsub.f32 1.0, %v323_v29  ;;  %v2571_v29 = vld [vmem:[#allocation7 + $0x108] sm:$0xff] }
  0xa1   :  { %2784 = vst [vmem:[#allocation24_spill] sm:$0xff] %v2571_v29  ;;  %827 = vmatpush.bf16.msrb.mxu0 %v2571_v29 }
  0xa2   :  { %v325_v36 = vmul.f32 %v2194_v28, %v324_v32  ;;  %v2573_v32 = vld [vmem:[#allocation7 + $0x148] sm:$0xff] }
  0xa3   :  { %2785 = vst [vmem:[#allocation25_spill] sm:$0xff] %v2573_v32  ;;  %840 = vmatpush.bf16.msrb.mxu1 %v2573_v32 }
  0xa4   :  { %v326_v42 = vadd.f32 %v2194_v28, %v325_v36  ;;  %v2579_v36 = vld [vmem:[#allocation7 + $0x1c8] sm:$0xff] }
  0xa5   :  { %2787 = vst [vmem:[#allocation27_spill] sm:$0xff] %v2579_v36  ;;  %866 = vmatpush.bf16.msrb.mxu3 %v2579_v36  ;;  %828 = vmatpush.bf16.msrb.mxu0 %v2583_v37 }
  0xa6   :  { %v330_v44 = vsel %vm329_vm2, %v2194_v28, %v326_v42  ;;  %v2566_v28 = vld [vmem:[#allocation2] sm:$0xff]  ;;  %v2585_v42 = vld [vmem:[#allocation7 + $0x140] sm:$0xff] }
  0xa7   :  { %v335_v45 = vsel %vm332_vm3, %v334_v43, %v330_v44  ;;  %282 = vmax.xlane.f32.xlu1 %v2566_v28  ;;  %2789 = vst [vmem:[#allocation29_spill] sm:$0xff] %v2585_v42  ;;  %v2589_v43 = vld [vmem:[#allocation7 + $0x180] sm:$0xff]  ;;  %841 = vmatpush.bf16.msrb.mxu1 %v2585_v42 }
  0xa8   :  { %v354_v47 = vmul.f32 %v335_v45, %v335_v45  ;;  %2790 = vst [vmem:[#allocation30_spill] sm:$0xff] %v2589_v43  ;;  %v2591_v44 = vld [vmem:[#allocation7 + $0x1c0] sm:$0xff]  ;;  %854 = vmatpush.bf16.msrb.mxu2 %v2589_v43 }
  0xa9   :  { %2791 = vst [vmem:[#allocation31_spill] sm:$0xff] %v2591_v44  ;;  %867 = vmatpush.bf16.msrb.mxu3 %v2591_v44 }
  0xaa   :  { %v355_v52 = vmul.f32 %v354_v47, %v353_v46 }
  0xac   :  { %v356_v15 = vadd.f32 1e-06, %v355_v52 }
  0xae   :  { %2195 = vrsqrt.f32 %v356_v15  ;;  %vm363_vm5 = vweird.f32 %v356_v15 }
  0xb4   :  { %v2196_v46 = vpop.eup %2195 }
  0xb5   :  { %v358_v47 = vmul.f32 %v2196_v46, %v356_v15  ;;  %vm364_vm4 = vweird.f32 %v2196_v46 }
  0xb6   :  { %vm365_vm6 = vmor %vm363_vm5, %vm364_vm4 }
  0xb7   :  { %v359_v52 = vmul.f32 %v2196_v46, %v358_v47 }
  0xb9   :  { %v360_v32 = vmul.f32 0.5, %v359_v52 }
  0xbb   :  { %v361_v29 = vsub.f32 1.5, %v360_v32 }
  0xbd   :  { %v362_v35 = vmul.f32 %v2196_v46, %v361_v29 }
  0xbf   :  { %v366_v36 = vsel %vm365_vm6, %v2196_v46, %v362_v35 }
  0xc0   :  { %v367_v14 = vmul.f32 %v366_v36, %v335_v45 }
  0xc2   :  { %v368_v55 = vmul.f32 0.1, %v367_v14 }
  0xc4   :  { %v369_v54 = vmul.f32 %v368_v55, %v2404_v4  ;;  %v370_v37 = vmul.f32 %v368_v55, %v2406_v5  ;;  %v371_v42 = vmul.f32 %v368_v55, %v2408_v6  ;;  %v372_v47 = vmul.f32 %v368_v55, %v2410_v7 }
  0xc5   :  { %v373_v15 = vmul.f32 %v368_v55, %v2412_v8  ;;  %v374_v45 = vmul.f32 %v368_v55, %v2414_v9  ;;  %v375_v4 = vmul.f32 %v368_v55, %v2416_v10  ;;  %v376_v5 = vmul.f32 %v368_v55, %v2418_v11 }
  0xc6   :  { %v377_v43 = vpack.c.bf16 %v369_v54, %v369_v54  ;;  %v378_v53 = vpack.c.bf16 %v370_v37, %v370_v37  ;;  %v379_v44 = vpack.c.bf16 %v371_v42, %v371_v42  ;;  %v380_v52 = vpack.c.bf16 %v372_v47, %v372_v47 }
  0xc7   :  { %v381_v14 = vpack.c.bf16 %v373_v15, %v373_v15  ;;  %v382_v6 = vpack.c.bf16 %v374_v45, %v374_v45  ;;  %v383_v29 = vpack.c.bf16 %v375_v4, %v375_v4  ;;  %v384_v7 = vpack.c.bf16 %v376_v5, %v376_v5 }
  0xc8   :  { %777 = vmatmul.bf16.vlgmr.msra.gmra.mxu0 %v377_v43  ;;  %790 = vmatmul.bf16.vlgmr.msra.gmra.mxu1 %v378_v53 }
  0xc9   :  { %803 = vmatmul.bf16.vlgmr.msra.gmra.mxu2 %v379_v44  ;;  %816 = vmatmul.bf16.vlgmr.msra.gmra.mxu3 %v380_v52 }
  0xd8   :  { %829 = vmatmul.bf16.vlgmr.msrb.gmra.mxu0 %v381_v14  ;;  %842 = vmatmul.bf16.vlgmr.msrb.gmra.mxu1 %v382_v6 }
  0xd9   :  { %855 = vmatmul.bf16.vlgmr.msrb.gmra.mxu2 %v383_v29  ;;  %868 = vmatmul.bf16.vlgmr.msrb.gmra.mxu3 %v384_v7 }
 0x11a   :  { %v283_v54 = vpop.xlane.xlu1 %282 }
 0x11b   :  { %v2606_v53 = vsub.f32 %v2566_v28, %v283_v54 }
 0x11d   :  { %2792 = vst [vmem:[#allocation32_spill] sm:$0xff] %v2606_v53  ;;  %v285_v8 = vmul.f32 1.442695, %v2606_v53  ;;  %v1940_v53 = vld [vmem:[#allocation8 + $0x128] sm:$0xf0] }
 0x11f   :  { %2197 = vpow2.f32 %v285_v8 }
 0x125   :  { %v2609_v9 = vpop.eup %2197 }
 0x126   :  { %287 = vadd.xlane.f32.xlu2 %v2609_v9 }
 0x145   :  { %v778_v10 = vpop.f32.mrf.mxu0  ;;  %v791_v11 = vpop.f32.mrf.mxu1 }
 0x146   :  { %v792_v37 = vadd.f32 %v791_v11, %v778_v10  ;;  %v2026_v11 = vld [vmem:[#allocation8 + $0x1c0] sm:$0xf] }
 0x14c   :  { %v804_v55 = vpop.f32.mrf.mxu2  ;;  %v817_v32 = vpop.f32.mrf.mxu3 }
 0x14d   :  { %v780_v35 = vpop.f32.mrf.mxu0  ;;  %v793_v36 = vpop.f32.mrf.mxu1  ;;  %v805_v42 = vadd.f32 %v804_v55, %v792_v37  ;;  %v2180_v55 = vld [vmem:[#allocation8 + $0x1dc] sm:$0xf0]  ;;  %v2034_v37 = vld [vmem:[#allocation8 + $0x1c8] sm:$0xf] }
 0x14e   :  { %v2027_v35 = vor.u32 %v2180_v55, %v2026_v11  ;;  %v2028_v36 = vld [vmem:[#allocation8 + $0x1e0] sm:$0xf0]  ;;  %v1962_v11 = vld [vmem:[#allocation8 + $0x140] sm:$0xf] }
 0x14f   :  { %v818_v46 = vadd.f32 %v817_v32, %v805_v42  ;;  %v2176_v32 = vld [vmem:[#allocation8 + $0x1c4] sm:$0xf]  ;;  %v2181_v42 = vld [vmem:[#allocation8 + $0x1e4] sm:$0xf0]  ;;  %v2164_v55 = vld [vmem:[#allocation8 + $0x15c] sm:$0xf0] }
 0x150   :  { %1219 = vmatpush.bf16.msra.mxu0 %v2027_v35  ;;  %v1970_v35 = vld [vmem:[#allocation8 + $0x148] sm:$0xf] }
 0x154   :  { %v806_v43 = vpop.f32.mrf.mxu2  ;;  %v819_v44 = vpop.f32.mrf.mxu3 }
 0x155   :  { %v830_v47 = vpop.f32.mrf.mxu0  ;;  %v843_v52 = vpop.f32.mrf.mxu1  ;;  %v2031_v43 = vor.u32 %v2176_v32, %v2028_v36  ;;  %v2035_v44 = vor.u32 %v2181_v42, %v2034_v37  ;;  %v2160_v36 = vld [vmem:[#allocation8 + $0x144] sm:$0xf]  ;;  %v1963_v42 = vor.u32 %v2164_v55, %v1962_v11 }
 0x156   :  { %v831_v15 = vadd.f32 %v830_v47, %v818_v46  ;;  %v2177_v46 = vld [vmem:[#allocation8 + $0x1cc] sm:$0xf]  ;;  %v1964_v37 = vld [vmem:[#allocation8 + $0x160] sm:$0xf0] }
 0x157   :  { %v2036_v47 = vld [vmem:[#allocation8 + $0x1e8] sm:$0xf0]  ;;  %1232 = vmatpush.bf16.msra.mxu1 %v2031_v43  ;;  %1245 = vmatpush.bf16.msra.mxu2 %v2035_v44  ;;  %v1967_v44 = vor.u32 %v2160_v36, %v1964_v37  ;;  %v2144_v36 = vld [vmem:[#allocation8 + $0xc4] sm:$0xf] }
 0x158   :  { %v844_v45 = vadd.f32 %v843_v52, %v831_v15  ;;  %v1994_v52 = vld [vmem:[#allocation8 + $0x180] sm:$0xf]  ;;  %v2039_v15 = vor.u32 %v2177_v46, %v2036_v47  ;;  %v2165_v46 = vld [vmem:[#allocation8 + $0x164] sm:$0xf0]  ;;  %v2161_v47 = vld [vmem:[#allocation8 + $0x14c] sm:$0xf] }
 0x159   :  { %v1972_v43 = vld [vmem:[#allocation8 + $0x168] sm:$0xf0] }
 0x15a   :  { %1258 = vmatpush.bf16.msra.mxu3 %v2039_v15  ;;  %v2152_v15 = vld [vmem:[#allocation8 + $0x104] sm:$0xf] }
 0x15c   :  { %v856_v4 = vpop.f32.mrf.mxu2  ;;  %v869_v5 = vpop.f32.mrf.mxu3 }
 0x15d   :  { %v857_v14 = vadd.f32 %v856_v4, %v844_v45  ;;  %v832_v6 = vpop.f32.mrf.mxu0  ;;  %v845_v29 = vpop.f32.mrf.mxu1  ;;  %v2168_v45 = vld [vmem:[#allocation8 + $0x184] sm:$0xf] }
 0x15e   :  { %v1996_v4 = vld [vmem:[#allocation8 + $0x1a0] sm:$0xf0]  ;;  %v2002_v6 = vld [vmem:[#allocation8 + $0x188] sm:$0xf] }
 0x15f   :  { %v870_v7 = vadd.f32 %v869_v5, %v857_v14  ;;  %v1999_v14 = vor.u32 %v2168_v45, %v1996_v4  ;;  %v2173_v29 = vld [vmem:[#allocation8 + $0x1a4] sm:$0xf0]  ;;  %v2156_v45 = vld [vmem:[#allocation8 + $0x11c] sm:$0xf0]  ;;  %v1975_v4 = vor.u32 %v2161_v47, %v1972_v43  ;;  %v2145_v47 = vld [vmem:[#allocation8 + $0xcc] sm:$0xf] }
 0x160   :  { %v1908_v43 = vld [vmem:[#allocation8 + $0xe8] sm:$0xf0] }
 0x161   :  { %v2613_v54 = vadd.f32 %v870_v7, %v2566_v28  ;;  %v2172_v28 = vld [vmem:[#allocation8 + $0x19c] sm:$0xf0]  ;;  %v2169_v7 = vld [vmem:[#allocation8 + $0x18c] sm:$0xf]  ;;  %1233 = vmatpush.bf16.msra.mxu1 %v1999_v14 }
 0x162   :  { %v1995_v5 = vor.u32 %v2172_v28, %v1994_v52  ;;  %v1971_v52 = vor.u32 %v2165_v46, %v1970_v35  ;;  %v1930_v28 = vld [vmem:[#allocation8 + $0x100] sm:$0xf]  ;;  %v1900_v35 = vld [vmem:[#allocation8 + $0xe0] sm:$0xf0]  ;;  %v1906_v46 = vld [vmem:[#allocation8 + $0xc8] sm:$0xf] }
 0x163   :  { %874 = vmax.xlane.f32.xlu1 %v2613_v54  ;;  %v1898_v14 = vld [vmem:[#allocation8 + $0xc0] sm:$0xf] }
 0x164   :  { %v858_v8 = vpop.f32.mrf.mxu2  ;;  %v871_v10 = vpop.f32.mrf.mxu3  ;;  %1220 = vmatpush.bf16.msra.mxu0 %v1995_v5  ;;  %v1931_v5 = vor.u32 %v2156_v45, %v1930_v28 }
 0x165   :  { %v2003_v8 = vor.u32 %v2173_v29, %v2002_v6  ;;  %v2004_v10 = vld [vmem:[#allocation8 + $0x1a8] sm:$0xf0]  ;;  %v1932_v6 = vld [vmem:[#allocation8 + $0x120] sm:$0xf0]  ;;  %v1938_v29 = vld [vmem:[#allocation8 + $0x108] sm:$0xf]  ;;  %1234 = vmatpush.bf16.msra.mxu1 %v1967_v44  ;;  %v1911_v44 = vor.u32 %v2145_v47, %v1908_v43 }
 0x166   :  { %v2007_v32 = vor.u32 %v2169_v7, %v2004_v10  ;;  %v2157_v7 = vld [vmem:[#allocation8 + $0x124] sm:$0xf0]  ;;  %v2153_v10 = vld [vmem:[#allocation8 + $0x10c] sm:$0xf]  ;;  %v1935_v11 = vor.u32 %v2152_v15, %v1932_v6  ;;  %v2140_v6 = vld [vmem:[#allocation8 + $0x9c] sm:$0xf0] }
 0x167   :  { %1246 = vmatpush.bf16.msra.mxu2 %v2003_v8  ;;  %v1939_v55 = vor.u32 %v2157_v7, %v1938_v29  ;;  %v2148_v8 = vld [vmem:[#allocation8 + $0xdc] sm:$0xf0]  ;;  %v1943_v37 = vor.u32 %v2153_v10, %v1940_v53  ;;  %v2136_v29 = vld [vmem:[#allocation8 + $0x84] sm:$0xf]  ;;  %v1842_v47 = vld [vmem:[#allocation8 + $0x48] sm:$0xf] }
 0x168   :  { %1259 = vmatpush.bf16.msra.mxu3 %v2007_v32  ;;  %1221 = vmatpush.bf16.msra.mxu0 %v1963_v42  ;;  %v2149_v32 = vld [vmem:[#allocation8 + $0xe4] sm:$0xf0]  ;;  %v1899_v51 = vor.u32 %v2148_v8, %v1898_v14  ;;  %v1903_v42 = vor.u32 %v2144_v36, %v1900_v35  ;;  %v1868_v10 = vld [vmem:[#allocation8 + $0xa0] sm:$0xf0]  ;;  %v2137_v14 = vld [vmem:[#allocation8 + $0x8c] sm:$0xf] }
 0x169   :  { %1235 = vmatpush.bf16.msra.mxu1 %v1935_v11  ;;  %v1907_v28 = vor.u32 %v2149_v32, %v1906_v46  ;;  %v2141_v11 = vld [vmem:[#allocation8 + $0xa4] sm:$0xf0]  ;;  %v1876_v8 = vld [vmem:[#allocation8 + $0xa8] sm:$0xf0]  ;;  %v1834_v36 = vld [vmem:[#allocation8 + $0x40] sm:$0xf] }
 0x16a   :  { %v2128_v35 = vld [vmem:[#allocation8 + $0x44] sm:$0xf]  ;;  %v2133_v43 = vld [vmem:[#allocation8 + $0x64] sm:$0xf0] }
 0x16b   :  { %1247 = vmatpush.bf16.msra.mxu2 %v1971_v52  ;;  %v1836_v32 = vld [vmem:[#allocation8 + $0x60] sm:$0xf0] }
 0x16c   :  { %1260 = vmatpush.bf16.msra.mxu3 %v1975_v4  ;;  %1222 = vmatpush.bf16.msra.mxu0 %v1931_v5  ;;  %v1866_v4 = vld [vmem:[#allocation8 + $0x80] sm:$0xf]  ;;  %v1874_v5 = vld [vmem:[#allocation8 + $0x88] sm:$0xf] }
 0x16d   :  { %1236 = vmatpush.bf16.msra.mxu1 %v1903_v42  ;;  %v1867_v7 = vor.u32 %v2140_v6, %v1866_v4  ;;  %v1839_v42 = vor.u32 %v2128_v35, %v1836_v32  ;;  %v2124_v4 = vld [vmem:[#allocation8 + $0x1c] sm:$0xf0]  ;;  %v2120_v6 = vld [vmem:[#allocation8 + $0x4] sm:$0xf]  ;;  %v2178_v35 = vld [vmem:[#allocation8 + $0x1d4] sm:$0xf] }
 0x16f   :  { %1248 = vmatpush.bf16.msra.mxu2 %v1939_v55  ;;  %v1875_v55 = vor.u32 %v2141_v11, %v1874_v5  ;;  %v1810_v5 = vld [vmem:[#allocation8 + $0x8] sm:$0xf] }
 0x170   :  { %1261 = vmatpush.bf16.msra.mxu3 %v1943_v37  ;;  %1223 = vmatpush.bf16.msra.mxu0 %v1899_v51  ;;  %v1871_v51 = vor.u32 %v2136_v29, %v1868_v10  ;;  %v2132_v37 = vld [vmem:[#allocation8 + $0x5c] sm:$0xf0]  ;;  %v1804_v10 = vld [vmem:[#allocation8 + $0x20] sm:$0xf0]  ;;  %v2125_v11 = vld [vmem:[#allocation8 + $0x24] sm:$0xf0] }
 0x171   :  { %v1835_v46 = vor.u32 %v2132_v37, %v1834_v36  ;;  %v2182_v37 = vld [vmem:[#allocation8 + $0x1ec] sm:$0xf0] }
 0x172   :  { %1237 = vmatpush.bf16.msra.mxu1 %v1871_v51  ;;  %v1807_v51 = vor.u32 %v2120_v6, %v1804_v10  ;;  %v2012_v10 = vld [vmem:[#allocation8 + $0x1b0] sm:$0xf0] }
 0x173   :  { %1249 = vmatpush.bf16.msra.mxu2 %v1907_v28  ;;  %v1843_v28 = vor.u32 %v2133_v43, %v1842_v47  ;;  %v2050_v43 = vld [vmem:[#allocation8 + $0x1d8] sm:$0xf] }
 0x174   :  { %1262 = vmatpush.bf16.msra.mxu3 %v1911_v44  ;;  %1224 = vmatpush.bf16.msra.mxu0 %v1867_v7  ;;  %v2129_v44 = vld [vmem:[#allocation8 + $0x4c] sm:$0xf] }
 0x176   :  { %1238 = vmatpush.bf16.msra.mxu1 %v1839_v42  ;;  %v2183_v42 = vld [vmem:[#allocation8 + $0x1f4] sm:$0xf0] }
 0x177   :  { %1250 = vmatpush.bf16.msra.mxu2 %v1875_v55  ;;  %v1811_v55 = vor.u32 %v2125_v11, %v1810_v5  ;;  %v2018_v5 = vld [vmem:[#allocation8 + $0x198] sm:$0xf] }
 0x178   :  { %1225 = vmatpush.bf16.msra.mxu0 %v1835_v46  ;;  %v2044_v46 = vld [vmem:[#allocation8 + $0x1f0] sm:$0xf0] }
 0x179   :  { %v2047_v47 = vor.u32 %v2178_v35, %v2044_v46  ;;  %v2162_v35 = vld [vmem:[#allocation8 + $0x154] sm:$0xf] }
 0x17a   :  { %1239 = vmatpush.bf16.msra.mxu1 %v1807_v51  ;;  %v2175_v51 = vld [vmem:[#allocation8 + $0x1b4] sm:$0xf0] }
 0x17b   :  { %1251 = vmatpush.bf16.msra.mxu2 %v1843_v28  ;;  %v2179_v28 = vld [vmem:[#allocation8 + $0x1dc] sm:$0xf] }
 0x17e   :  { %1284 = vmatpush.bf16.msrb.mxu1 %v2047_v47  ;;  %v1980_v47 = vld [vmem:[#allocation8 + $0x170] sm:$0xf0] }
 0x17f   :  { %1252 = vmatpush.bf16.msra.mxu2 %v1811_v55  ;;  %v2171_v55 = vld [vmem:[#allocation8 + $0x19c] sm:$0xf] }
 0x199   :  { %v2620_v29 = vpop.xlane.xlu2 %287 }
 0x19a   :  { %vm294_vm7 = vweird.f32 %v2620_v29 }
 0x1d6   :  { %v875_v52 = vpop.xlane.xlu1 %874 }
 0x1d7   :  { %v876_v45 = vsub.f32 %v2613_v54, %v875_v52  ;;  %v1879_v54 = vor.u32 %v2137_v14, %v1876_v8  ;;  %v1844_v52 = vld [vmem:[#allocation8 + $0x68] sm:$0xf0] }
 0x1d8   :  { %v2121_v14 = vld [vmem:[#allocation8 + $0xc] sm:$0xf] }
 0x1d9   :  { %v877_v53 = vmul.f32 1.442695, %v876_v45  ;;  %1263 = vmatpush.bf16.msra.mxu3 %v1879_v54  ;;  %v1847_v45 = vor.u32 %v2129_v44, %v1844_v52  ;;  %v1812_v8 = vld [vmem:[#allocation8 + $0x28] sm:$0xf0]  ;;  %v2042_v54 = vld [vmem:[#allocation8 + $0x1d0] sm:$0xf]  ;;  %v2051_v44 = vor.u32 %v2183_v42, %v2050_v43 }
 0x1da   :  { %v1815_v36 = vor.u32 %v2121_v14, %v1812_v8  ;;  %v2043_v32 = vor.u32 %v2182_v37, %v2042_v54  ;;  %v2052_v52 = vld [vmem:[#allocation8 + $0x1f8] sm:$0xf0]  ;;  %v2019_v8 = vor.u32 %v2175_v51, %v2018_v5  ;;  %v2166_v37 = vld [vmem:[#allocation8 + $0x16c] sm:$0xf0]  ;;  %v1986_v43 = vld [vmem:[#allocation8 + $0x158] sm:$0xf] }
 0x1db   :  { %2199 = vpow2.f32 %v877_v53  ;;  %v1802_v53 = vld [vmem:[#allocation8] sm:$0xf]  ;;  %1297 = vmatpush.bf16.msrb.mxu2 %v2051_v44  ;;  %v2020_v14 = vld [vmem:[#allocation8 + $0x1b8] sm:$0xf0]  ;;  %v2167_v42 = vld [vmem:[#allocation8 + $0x174] sm:$0xf0] }
 0x1dc   :  { %v1803_v7 = vor.u32 %v2124_v4, %v1802_v53  ;;  %2201 = vrcp.f32 %v2620_v29  ;;  %v2174_v53 = vld [vmem:[#allocation8 + $0x1ac] sm:$0xf0]  ;;  %v2055_v4 = vor.u32 %v2179_v28, %v2052_v52  ;;  %v2023_v54 = vor.u32 %v2171_v55, %v2020_v14  ;;  %v2163_v52 = vld [vmem:[#allocation8 + $0x15c] sm:$0xf]  ;;  %v2154_v5 = vld [vmem:[#allocation8 + $0x114] sm:$0xf] }
 0x1dd   :  { %1264 = vmatpush.bf16.msra.mxu3 %v1847_v45  ;;  %v2010_v45 = vld [vmem:[#allocation8 + $0x190] sm:$0xf]  ;;  %v1983_v28 = vor.u32 %v2162_v35, %v1980_v47  ;;  %v1987_v44 = vor.u32 %v2167_v42, %v1986_v43  ;;  %v1954_v51 = vld [vmem:[#allocation8 + $0x118] sm:$0xf]  ;;  %v2146_v42 = vld [vmem:[#allocation8 + $0xd4] sm:$0xf] }
 0x1de   :  { %1226 = vmatpush.bf16.msra.mxu0 %v1803_v7  ;;  %v2011_v6 = vor.u32 %v2174_v53, %v2010_v45  ;;  %v2170_v7 = vld [vmem:[#allocation8 + $0x194] sm:$0xf]  ;;  %v1988_v45 = vld [vmem:[#allocation8 + $0x178] sm:$0xf0]  ;;  %v2159_v55 = vld [vmem:[#allocation8 + $0x134] sm:$0xf0] }
 0x1df   :  { %v2015_v11 = vor.u32 %v2170_v7, %v2012_v10  ;;  %1298 = vmatpush.bf16.msrb.mxu2 %v2019_v8  ;;  %v1991_v53 = vor.u32 %v2163_v52, %v1988_v45  ;;  %v1946_v7 = vld [vmem:[#allocation8 + $0x110] sm:$0xf]  ;;  %v1955_v8 = vor.u32 %v2159_v55, %v1954_v51  ;;  %v1922_v52 = vld [vmem:[#allocation8 + $0xd8] sm:$0xf]  ;;  %v2138_v55 = vld [vmem:[#allocation8 + $0x94] sm:$0xf] }
 0x1e0   :  { %v2158_v10 = vld [vmem:[#allocation8 + $0x12c] sm:$0xf0]  ;;  %v2151_v45 = vld [vmem:[#allocation8 + $0xf4] sm:$0xf0] }
 0x1e1   :  { %v2617_v15 = vpop.eup %2199  ;;  %1265 = vmatpush.bf16.msra.mxu3 %v1815_v36  ;;  %v1978_v36 = vld [vmem:[#allocation8 + $0x150] sm:$0xf]  ;;  %1285 = vmatpush.bf16.msrb.mxu1 %v2015_v11  ;;  %v1948_v11 = vld [vmem:[#allocation8 + $0x130] sm:$0xf0] }
 0x1e2   :  { %879 = vadd.xlane.f32.xlu2 %v2617_v15  ;;  %1271 = vmatpush.bf16.msrb.mxu0 %v2043_v32  ;;  %v2623_v46 = vpop.eup %2201  ;;  %v1979_v32 = vor.u32 %v2166_v37, %v1978_v36  ;;  %v1951_v14 = vor.u32 %v2154_v5, %v1948_v11  ;;  %v2155_v36 = vld [vmem:[#allocation8 + $0x11c] sm:$0xf]  ;;  %v1914_v47 = vld [vmem:[#allocation8 + $0xd0] sm:$0xf] }
 0x1e3   :  { %1299 = vmatpush.bf16.msrb.mxu2 %v1987_v44  ;;  %v1956_v37 = vld [vmem:[#allocation8 + $0x138] sm:$0xf0]  ;;  %v2150_v43 = vld [vmem:[#allocation8 + $0xec] sm:$0xf0]  ;;  %vm295_vm8 = vweird.f32 %v2623_v46 }
 0x1e4   :  { %v1924_v5 = vld [vmem:[#allocation8 + $0xf8] sm:$0xf0]  ;;  %v1882_v11 = vld [vmem:[#allocation8 + $0x90] sm:$0xf]  ;;  %vm2636_vm9 = vmor %vm294_vm7, %vm295_vm8 }
 0x1e5   :  { %1310 = vmatpush.bf16.msrb.mxu3 %v2055_v4  ;;  %v2627_v4 = vmul.f32 %v2623_v46, %v2620_v29  ;;  %1286 = vmatpush.bf16.msrb.mxu1 %v1983_v28  ;;  %v1916_v28 = vld [vmem:[#allocation8 + $0xf0] sm:$0xf0]  ;;  %v2142_v51 = vld [vmem:[#allocation8 + $0xac] sm:$0xf0] }
 0x1e6   :  { %1272 = vmatpush.bf16.msrb.mxu0 %v2011_v6  ;;  %v1947_v6 = vor.u32 %v2158_v10, %v1946_v7  ;;  %v1919_v44 = vor.u32 %v2146_v42, %v1916_v28  ;;  %v1923_v7 = vor.u32 %v2151_v45, %v1922_v52  ;;  %v2147_v10 = vld [vmem:[#allocation8 + $0xdc] sm:$0xf]  ;;  %v2134_v42 = vld [vmem:[#allocation8 + $0x6c] sm:$0xf0]  ;;  %v2130_v52 = vld [vmem:[#allocation8 + $0x54] sm:$0xf] }
 0x1e7   :  { %v291_v35 = vsub.f32 1.0, %v2627_v4  ;;  %1300 = vmatpush.bf16.msrb.mxu2 %v1955_v8  ;;  %v1884_v4 = vld [vmem:[#allocation8 + $0xb0] sm:$0xf0]  ;;  %v2143_v8 = vld [vmem:[#allocation8 + $0xb4] sm:$0xf0] }
 0x1e8   :  { %v1852_v45 = vld [vmem:[#allocation8 + $0x70] sm:$0xf0] }
 0x1e9   :  { %1311 = vmatpush.bf16.msrb.mxu3 %v2023_v54  ;;  %v1959_v54 = vor.u32 %v2155_v36, %v1956_v37  ;;  %1287 = vmatpush.bf16.msrb.mxu1 %v1951_v14  ;;  %v1887_v14 = vor.u32 %v2138_v55, %v1884_v4  ;;  %v1890_v36 = vld [vmem:[#allocation8 + $0x98] sm:$0xf]  ;;  %v2139_v37 = vld [vmem:[#allocation8 + $0x9c] sm:$0xf]  ;;  %v2126_v55 = vld [vmem:[#allocation8 + $0x2c] sm:$0xf0] }
 0x1ea   :  { %1273 = vmatpush.bf16.msrb.mxu0 %v1979_v32  ;;  %v1915_v32 = vor.u32 %v2150_v43, %v1914_v47  ;;  %v1891_v47 = vor.u32 %v2143_v8, %v1890_v36  ;;  %v1892_v43 = vld [vmem:[#allocation8 + $0xb8] sm:$0xf0]  ;;  %v2122_v4 = vld [vmem:[#allocation8 + $0x14] sm:$0xf]  ;;  %v1826_v8 = vld [vmem:[#allocation8 + $0x18] sm:$0xf] }
 0x1eb   :  { %1301 = vmatpush.bf16.msrb.mxu2 %v1923_v7  ;;  %v1895_v28 = vor.u32 %v2139_v37, %v1892_v43  ;;  %v1820_v36 = vld [vmem:[#allocation8 + $0x30] sm:$0xf0]  ;;  %v2127_v37 = vld [vmem:[#allocation8 + $0x34] sm:$0xf0]  ;;  %v292_v43 = vmul.f32 %v2623_v46, %v291_v35 }
 0x1ed   :  { %1312 = vmatpush.bf16.msrb.mxu3 %v1991_v53  ;;  %v1927_v53 = vor.u32 %v2147_v10, %v1924_v5  ;;  %1288 = vmatpush.bf16.msrb.mxu1 %v1919_v44  ;;  %v1858_v10 = vld [vmem:[#allocation8 + $0x58] sm:$0xf]  ;;  %v293_v35 = vadd.f32 %v2623_v46, %v292_v43 }
 0x1ee   :  { %1274 = vmatpush.bf16.msrb.mxu0 %v1947_v6  ;;  %v1883_v6 = vor.u32 %v2142_v51, %v1882_v11  ;;  %v1855_v11 = vor.u32 %v2130_v52, %v1852_v45  ;;  %v1818_v51 = vld [vmem:[#allocation8 + $0x10] sm:$0xf]  ;;  %v1859_v7 = vor.u32 %v2135_v50, %v1858_v10  ;;  %v1827_v50 = vor.u32 %v2127_v37, %v1826_v8  ;;  %v2216_v43 = vld [vmem:[#allocation7 + $0x78] sm:$0xff]  ;;  %v2228_v52 = vld [vmem:[#allocation7 + $0x60] sm:$0xff] }
 0x1ef   :  { %1302 = vmatpush.bf16.msrb.mxu2 %v1891_v47 }
 0x1f1   :  { %1313 = vmatpush.bf16.msrb.mxu3 %v1959_v54  ;;  %v1850_v54 = vld [vmem:[#allocation8 + $0x50] sm:$0xf]  ;;  %1289 = vmatpush.bf16.msrb.mxu1 %v1887_v14  ;;  %v1823_v14 = vor.u32 %v2122_v4, %v1820_v36 }
 0x1f2   :  { %1275 = vmatpush.bf16.msrb.mxu0 %v1915_v32  ;;  %v1860_v32 = vld [vmem:[#allocation8 + $0x78] sm:$0xf0]  ;;  %v1851_v44 = vor.u32 %v2134_v42, %v1850_v54  ;;  %v298_v54 = vand.u32 2147483647, %v2620_v29  ;;  %v1831_v42 = vor.u32 %v2123_v48, %v1828_v41 }
 0x1f3   :  { %1303 = vmatpush.bf16.msrb.mxu2 %v1859_v7 }
 0x1f4   :  { %vm299_vm10 = vcmp.eq.f32.partialorder %v298_v54, 8.507059e+37  ;;  %v2223_v54 = vld [vmem:[#allocation7 + $0x28] sm:$0xff] }
 0x1f5   :  { %1314 = vmatpush.bf16.msrb.mxu3 %v1927_v53  ;;  %v1863_v53 = vor.u32 %v2131_v49, %v1860_v32  ;;  %1290 = vmatpush.bf16.msrb.mxu1 %v1855_v11  ;;  %v300_v49 = vand.u32 2147483648, %v2620_v29 }
 0x1f6   :  { %1276 = vmatpush.bf16.msrb.mxu0 %v1883_v6  ;;  %v1819_v6 = vor.u32 %v2126_v55, %v1818_v51 }
 0x1f7   :  { %1304 = vmatpush.bf16.msrb.mxu2 %v1827_v50  ;;  %v301_v10 = vor.u32 1.1754944e-38, %v300_v49  ;;  %v2220_v50 = vld [vmem:[#allocation7 + $0x70] sm:$0xff]  ;;  %v2224_v49 = vld [vmem:[#allocation7 + $0x68] sm:$0xff] }
 0x1f9   :  { %1315 = vmatpush.bf16.msrb.mxu3 %v1895_v28  ;;  %1291 = vmatpush.bf16.msrb.mxu1 %v1823_v14  ;;  %v2218_v14 = vld [vmem:[#allocation7 + $0xf8] sm:$0xff] }
 0x1fa   :  { %1277 = vmatpush.bf16.msrb.mxu0 %v1851_v44  ;;  %v297_v44 = vsel %vm2636_vm9, %v2623_v46, %v293_v35  ;;  %v2226_v35 = vld [vmem:[#allocation7 + $0xe8] sm:$0xff] }
 0x1fb   :  { %v302_v51 = vsel %vm299_vm10, %v301_v10, %v297_v44 }
 0x1fc   :  { %v2644_v36 = vmul.f32 %v2609_v9, %v302_v51  ;;  %v2219_v9 = vld [vmem:[#allocation7 + $0x30] sm:$0xff] }
 0x1fd   :  { %1316 = vmatpush.bf16.msrb.mxu3 %v1863_v53 }
 0x1fe   :  { %1278 = vmatpush.bf16.msrb.mxu0 %v1819_v6  ;;  %v2217_v6 = vld [vmem:[#allocation7 + $0xb8] sm:$0xff] }
 0x201   :  { %1317 = vmatpush.bf16.msrb.mxu3 %v1831_v42  ;;  %v2225_v42 = vld [vmem:[#allocation7 + $0xa8] sm:$0xff] }
 0x255   :  { %v880_v5 = vpop.xlane.xlu2 %879 }
 0x256   :  { %2203 = vrcp.f32 %v880_v5  ;;  %v892_v32 = vand.u32 2147483648, %v880_v5  ;;  %v890_v48 = vand.u32 2147483647, %v880_v5  ;;  %vm886_vm12 = vweird.f32 %v880_v5 }
 0x258   :  { %v893_v7 = vor.u32 1.1754944e-38, %v892_v32  ;;  %vm891_vm14 = vcmp.eq.f32.partialorder %v890_v48, 8.507059e+37 }
 0x25c   :  { %v2204_v47 = vpop.eup %2203 }
 0x25d   :  { %v882_v28 = vmul.f32 %v2204_v47, %v880_v5  ;;  %vm887_vm11 = vweird.f32 %v2204_v47  ;;  %v2215_v5 = vld [vmem:[#allocation7 + $0x38] sm:$0xff] }
 0x25e   :  { %vm888_vm13 = vmor %vm886_vm12, %vm887_vm11 }
 0x25f   :  { %v883_v45 = vsub.f32 1.0, %v882_v28  ;;  %v2227_v28 = vld [vmem:[#allocation7 + $0x20] sm:$0xff] }
 0x261   :  { %v884_v41 = vmul.f32 %v2204_v47, %v883_v45 }
 0x263   :  { %v885_v11 = vadd.f32 %v2204_v47, %v884_v41 }
 0x265   :  { %v889_v55 = vsel %vm888_vm13, %v2204_v47, %v885_v11  ;;  %v2222_v47 = vld [vmem:[#allocation7 + $0xf0] sm:$0xff] }
 0x266   :  { %v894_v4 = vsel %vm891_vm14, %v893_v7, %v889_v55 }
 0x267   :  { %v895_v53 = vmul.f32 %v2617_v15, %v894_v4  ;;  %v2221_v15 = vld [vmem:[#allocation7 + $0xb0] sm:$0xff] }
 0x269   :  { %v896_v8 = vsub.f32 %v895_v53, %v2644_v36 }
 0x26b   :  { %v897_v37 = vmul.f32 0.5, %v896_v8 }
 0x26d   :  { %v898_v46 = vpack.c.bf16 %v897_v37, %v897_v37 }
 0x26f   :  { %1227 = vmatmul.bf16.vlgmr.msra.gmra.mxu0 %v898_v46  ;;  %1240 = vmatmul.bf16.vlgmr.msra.gmra.mxu1 %v898_v46 }
 0x270   :  { %1253 = vmatmul.bf16.vlgmr.msra.gmra.mxu2 %v898_v46  ;;  %1266 = vmatmul.bf16.vlgmr.msra.gmra.mxu3 %v898_v46 }
 0x271   :  { %1404 = vmatpush.bf16.msra.mxu0 %v2215_v5  ;;  %1417 = vmatpush.bf16.msra.mxu1 %v2216_v43 }
 0x272   :  { %1430 = vmatpush.bf16.msra.mxu2 %v2217_v6  ;;  %1443 = vmatpush.bf16.msra.mxu3 %v2218_v14 }
 0x275   :  { %1405 = vmatpush.bf16.msra.mxu0 %v2219_v9  ;;  %1418 = vmatpush.bf16.msra.mxu1 %v2220_v50 }
 0x276   :  { %1431 = vmatpush.bf16.msra.mxu2 %v2221_v15  ;;  %1444 = vmatpush.bf16.msra.mxu3 %v2222_v47 }
 0x279   :  { %1406 = vmatpush.bf16.msra.mxu0 %v2223_v54  ;;  %1419 = vmatpush.bf16.msra.mxu1 %v2224_v49 }
 0x27a   :  { %1432 = vmatpush.bf16.msra.mxu2 %v2225_v42  ;;  %1445 = vmatpush.bf16.msra.mxu3 %v2226_v35 }
 0x27d   :  { %1407 = vmatpush.bf16.msra.mxu0 %v2227_v28  ;;  %1420 = vmatpush.bf16.msra.mxu1 %v2228_v52 }
 0x27e   :  { %1433 = vmatpush.bf16.msra.mxu2 %v2444_v56  ;;  %1446 = vmatpush.bf16.msra.mxu3 %v2446_v57  ;;  %v2795_v56 = vld [vmem:[#allocation15_spill] sm:$0xff]  ;;  %v2796_v57 = vld [vmem:[#allocation16_spill] sm:$0xff] }
 0x27f   :  { %1279 = vmatmul.bf16.vlgmr.msrb.gmra.mxu0 %v898_v46  ;;  %1292 = vmatmul.bf16.vlgmr.msrb.gmra.mxu1 %v898_v46 }
 0x280   :  { %1305 = vmatmul.bf16.vlgmr.msrb.gmra.mxu2 %v898_v46  ;;  %1318 = vmatmul.bf16.vlgmr.msrb.gmra.mxu3 %v898_v46 }
 0x281   :  { %1408 = vmatpush.bf16.msra.mxu0 %v2450_v58  ;;  %1421 = vmatpush.bf16.msra.mxu1 %v2452_v59  ;;  %v2797_v58 = vld [vmem:[#allocation17_spill] sm:$0xff]  ;;  %v2798_v59 = vld [vmem:[#allocation18_spill] sm:$0xff] }
 0x282   :  { %1434 = vmatpush.bf16.msra.mxu2 %v2454_v60  ;;  %1447 = vmatpush.bf16.msra.mxu3 %v2456_v61  ;;  %v2799_v60 = vld [vmem:[#allocation19_spill] sm:$0xff]  ;;  %v2800_v61 = vld [vmem:[#allocation20_spill] sm:$0xff] }
 0x285   :  { %1409 = vmatpush.bf16.msra.mxu0 %v2462_v62  ;;  %1422 = vmatpush.bf16.msra.mxu1 %v2464_v63  ;;  %v2801_v62 = vld [vmem:[#allocation21_spill] sm:$0xff]  ;;  %v2802_v63 = vld [vmem:[#allocation22_spill] sm:$0xff] }
 0x286   :  { %1435 = vmatpush.bf16.msra.mxu2 %v2466_v0  ;;  %1448 = vmatpush.bf16.msra.mxu3 %v2468_v1  ;;  %v2803_v0 = vld [vmem:[#allocation23_spill] sm:$0xff]  ;;  %v2804_v1 = vld [vmem:[#allocation24_spill] sm:$0xff] }
 0x289   :  { %1410 = vmatpush.bf16.msra.mxu0 %v2474_v2  ;;  %1423 = vmatpush.bf16.msra.mxu1 %v2476_v3  ;;  %v2805_v2 = vld [vmem:[#allocation25_spill] sm:$0xff]  ;;  %v2806_v3 = vld [vmem:[#allocation26_spill] sm:$0xff] }
 0x28a   :  { %1436 = vmatpush.bf16.msra.mxu2 %v2478_v12  ;;  %1449 = vmatpush.bf16.msra.mxu3 %v2480_v13  ;;  %v2807_v12 = vld [vmem:[#allocation27_spill] sm:$0xff]  ;;  %v2808_v13 = vld [vmem:[#allocation28_spill] sm:$0xff] }
 0x28d   :  { %1411 = vmatpush.bf16.msra.mxu0 %v2486_v16  ;;  %1424 = vmatpush.bf16.msra.mxu1 %v2488_v17  ;;  %v2809_v16 = vld [vmem:[#allocation29_spill] sm:$0xff]  ;;  %v2810_v17 = vld [vmem:[#allocation30_spill] sm:$0xff] }
 0x28e   :  { %1437 = vmatpush.bf16.msra.mxu2 %v2490_v18  ;;  %1450 = vmatpush.bf16.msra.mxu3 %v2492_v19  ;;  %v2811_v18 = vld [vmem:[#allocation31_spill] sm:$0xff] }
 0x291   :  { %1456 = vmatpush.bf16.msrb.mxu0 %v2494_v20  ;;  %1469 = vmatpush.bf16.msrb.mxu1 %v2496_v21 }
 0x292   :  { %1482 = vmatpush.bf16.msrb.mxu2 %v2500_v22  ;;  %1495 = vmatpush.bf16.msrb.mxu3 %v2502_v23 }
 0x295   :  { %1457 = vmatpush.bf16.msrb.mxu0 %v2510_v24  ;;  %1470 = vmatpush.bf16.msrb.mxu1 %v2512_v25 }
 0x296   :  { %1483 = vmatpush.bf16.msrb.mxu2 %v2514_v26  ;;  %1496 = vmatpush.bf16.msrb.mxu3 %v2516_v27 }
 0x299   :  { %1458 = vmatpush.bf16.msrb.mxu0 %v2522_v30  ;;  %1471 = vmatpush.bf16.msrb.mxu1 %v2524_v31 }
 0x29a   :  { %1484 = vmatpush.bf16.msrb.mxu2 %v2526_v33  ;;  %1497 = vmatpush.bf16.msrb.mxu3 %v2528_v34 }
 0x29d   :  { %1459 = vmatpush.bf16.msrb.mxu0 %v2532_v38  ;;  %1472 = vmatpush.bf16.msrb.mxu1 %v2534_v39 }
 0x29e   :  { %1485 = vmatpush.bf16.msrb.mxu2 %v2538_v40  ;;  %1498 = vmatpush.bf16.msrb.mxu3 %v2795_v56 }
 0x2a1   :  { %1460 = vmatpush.bf16.msrb.mxu0 %v2796_v57  ;;  %1473 = vmatpush.bf16.msrb.mxu1 %v2797_v58 }
 0x2a2   :  { %1486 = vmatpush.bf16.msrb.mxu2 %v2798_v59  ;;  %1499 = vmatpush.bf16.msrb.mxu3 %v2799_v60 }
 0x2a5   :  { %1461 = vmatpush.bf16.msrb.mxu0 %v2800_v61  ;;  %1474 = vmatpush.bf16.msrb.mxu1 %v2801_v62 }
 0x2a6   :  { %1487 = vmatpush.bf16.msrb.mxu2 %v2802_v63  ;;  %1500 = vmatpush.bf16.msrb.mxu3 %v2803_v0 }
 0x2a9   :  { %1462 = vmatpush.bf16.msrb.mxu0 %v2804_v1  ;;  %1475 = vmatpush.bf16.msrb.mxu1 %v2805_v2 }
 0x2aa   :  { %1488 = vmatpush.bf16.msrb.mxu2 %v2806_v3  ;;  %1501 = vmatpush.bf16.msrb.mxu3 %v2807_v12 }
 0x2ad   :  { %1463 = vmatpush.bf16.msrb.mxu0 %v2808_v13  ;;  %1476 = vmatpush.bf16.msrb.mxu1 %v2809_v16 }
 0x2ae   :  { %1489 = vmatpush.bf16.msrb.mxu2 %v2810_v17  ;;  %1502 = vmatpush.bf16.msrb.mxu3 %v2811_v18 }
 0x2ec   :  { %v2698_v19 = vpop.f32.mrf.mxu0  ;;  %v2700_v20 = vpop.f32.mrf.mxu1 }
 0x2ed   :  { %v1356_v23 = vmul.f32 %v2698_v19, %v2698_v19  ;;  %v1357_v24 = vmul.f32 %v2700_v20, %v2700_v20  ;;  %v1323_v48 = vand.u32 2147483647, %v2698_v19  ;;  %v1324_v11 = vand.u32 2147483647, %v2700_v20 }
 0x2ef   :  { %v1364_v30 = vadd.f32 %v1357_v24, %v1356_v23 }
 0x2f3   :  { %v2702_v21 = vpop.f32.mrf.mxu2  ;;  %v2704_v22 = vpop.f32.mrf.mxu3 }
 0x2f4   :  { %v1230_v25 = vpop.f32.mrf.mxu0  ;;  %v1243_v26 = vpop.f32.mrf.mxu1  ;;  %v1358_v27 = vmul.f32 %v2702_v21, %v2702_v21  ;;  %v1359_v38 = vmul.f32 %v2704_v22, %v2704_v22  ;;  %v1325_v7 = vand.u32 2147483647, %v2702_v21  ;;  %v1326_v55 = vand.u32 2147483647, %v2704_v22 }
 0x2f6   :  { %v1365_v31 = vadd.f32 %v1364_v30, %v1358_v27 }
 0x2f8   :  { %v1366_v10 = vadd.f32 %v1365_v31, %v1359_v38 }
 0x2fb   :  { %v1256_v33 = vpop.f32.mrf.mxu2  ;;  %v1269_v34 = vpop.f32.mrf.mxu3 }
 0x2fc   :  { %v2714_v39 = vpop.f32.mrf.mxu0  ;;  %v2716_v40 = vpop.f32.mrf.mxu1 }
 0x2fd   :  { %v1360_v45 = vmul.f32 %v2714_v39, %v2714_v39  ;;  %v1327_v32 = vand.u32 2147483647, %v2714_v39  ;;  %v1328_v44 = vand.u32 2147483647, %v2716_v40  ;;  %v1361_v51 = vmul.f32 %v2716_v40, %v2716_v40 }
 0x2ff   :  { %v1367_v41 = vadd.f32 %v1366_v10, %v1360_v45  ;;  %v1331_v8 = vmax.f32 %v1323_v48, %v1327_v32  ;;  %v1332_v37 = vmax.f32 %v1324_v11, %v1328_v44 }
 0x301   :  { %v1368_v9 = vadd.f32 %v1367_v41, %v1361_v51  ;;  %v1335_v42 = vmax.f32 %v1331_v8, %v1332_v37 }
 0x303   :  { %v2728_v4 = vpop.f32.mrf.mxu2  ;;  %v2730_v53 = vpop.f32.mrf.mxu3 }
 0x304   :  { %v1329_v46 = vand.u32 2147483647, %v2728_v4  ;;  %v1362_v5 = vmul.f32 %v2728_v4, %v2728_v4  ;;  %v1330_v43 = vand.u32 2147483647, %v2730_v53  ;;  %v1282_v6 = vpop.f32.mrf.mxu0  ;;  %v1295_v14 = vpop.f32.mrf.mxu1  ;;  %v1363_v50 = vmul.f32 %v2730_v53, %v2730_v53 }
 0x306   :  { %v1369_v15 = vadd.f32 %v1368_v9, %v1362_v5  ;;  %v1333_v47 = vmax.f32 %v1325_v7, %v1329_v46  ;;  %v1334_v54 = vmax.f32 %v1326_v55, %v1330_v43 }
 0x308   :  { %v1370_v49 = vadd.f32 %v1369_v15, %v1363_v50  ;;  %v1336_v35 = vmax.f32 %v1333_v47, %v1334_v54 }
 0x30a   :  { %1371 = vadd.xlane.f32.xlu1 %v1370_v49  ;;  %v1337_v28 = vmax.f32 %v1335_v42, %v1336_v35 }
 0x30b   :  { %v1308_v52 = vpop.f32.mrf.mxu2  ;;  %v1321_v56 = vpop.f32.mrf.mxu3 }
 0x30c   :  { %1338 = vmax.xlane.f32.xlu0 %v1337_v28 }
 0x37d   :  { %v1372_v16 = vpop.xlane.xlu1 %1371 }
 0x37f   :  { %v1339_v57 = vpop.xlane.xlu0 %1338 }
 0x380   :  { %v1340_v58 = vadd.f32 1e-12, %v1339_v57  ;;  %v2229_v57 = vld [vmem:[#allocation2] sm:$0xff] }
 0x382   :  { %2205 = vrcp.f32 %v1340_v58  ;;  %v1352_v62 = vand.u32 2147483648, %v1340_v58  ;;  %v1350_v0 = vand.u32 2147483647, %v1340_v58  ;;  %vm1346_vm0 = vweird.f32 %v1340_v58 }
 0x384   :  { %v1353_v2 = vor.u32 1.1754944e-38, %v1352_v62  ;;  %vm1351_vm2 = vcmp.eq.f32.partialorder %v1350_v0, 8.507059e+37 }
 0x388   :  { %v2206_v59 = vpop.eup %2205 }
 0x389   :  { %v1342_v60 = vmul.f32 %v2206_v59, %v1340_v58  ;;  %vm1347_vm15 = vweird.f32 %v2206_v59 }
 0x38a   :  { %vm1348_vm1 = vmor %vm1346_vm0, %vm1347_vm15 }
 0x38b   :  { %v1343_v61 = vsub.f32 1.0, %v1342_v60 }
 0x38d   :  { %v1344_v63 = vmul.f32 %v2206_v59, %v1343_v61 }
 0x38f   :  { %v1345_v1 = vadd.f32 %v2206_v59, %v1344_v63 }
 0x391   :  { %v1349_v3 = vsel %vm1348_vm1, %v2206_v59, %v1345_v1 }
 0x392   :  { %v1354_v12 = vsel %vm1351_vm2, %v1353_v2, %v1349_v3 }
 0x393   :  { %v1373_v13 = vmul.f32 %v1354_v12, %v1354_v12 }
 0x395   :  { %v1374_v17 = vmul.f32 %v1373_v13, %v1372_v16  ;;  %v2812_v16 = vld [vmem:[#allocation32_spill] sm:$0xff] }
 0x397   :  { %v1375_v18 = vadd.f32 1e-06, %v1374_v17 }
 0x399   :  { %2207 = vrsqrt.f32 %v1375_v18  ;;  %vm1382_vm4 = vweird.f32 %v1375_v18 }
 0x39f   :  { %v2208_v23 = vpop.eup %2207 }
 0x3a0   :  { %v1377_v24 = vmul.f32 %v2208_v23, %v1375_v18  ;;  %vm1383_vm3 = vweird.f32 %v2208_v23 }
 0x3a1   :  { %vm1384_vm5 = vmor %vm1382_vm4, %vm1383_vm3 }
 0x3a2   :  { %v1378_v25 = vmul.f32 %v2208_v23, %v1377_v24 }
 0x3a4   :  { %v1379_v26 = vmul.f32 0.5, %v1378_v25 }
 0x3a6   :  { %v1380_v27 = vsub.f32 1.5, %v1379_v26 }
 0x3a8   :  { %v1381_v30 = vmul.f32 %v2208_v23, %v1380_v27 }
 0x3aa   :  { %v1385_v31 = vsel %vm1384_vm5, %v2208_v23, %v1381_v30 }
 0x3ab   :  { %v1386_v33 = vmul.f32 %v1385_v31, %v1354_v12 }
 0x3ad   :  { %v1387_v34 = vmul.f32 2.0, %v1386_v33 }
 0x3af   :  { %v1388_v38 = vmul.f32 %v1387_v34, %v2698_v19  ;;  %v1389_v45 = vmul.f32 %v1387_v34, %v2700_v20  ;;  %v1390_v10 = vmul.f32 %v1387_v34, %v2702_v21  ;;  %v1391_v32 = vmul.f32 %v1387_v34, %v2704_v22 }
 0x3b0   :  { %v1392_v51 = vmul.f32 %v1387_v34, %v2714_v39  ;;  %v1393_v7 = vmul.f32 %v1387_v34, %v2716_v40  ;;  %v1394_v19 = vmul.f32 %v1387_v34, %v2728_v4  ;;  %v1395_v20 = vmul.f32 %v1387_v34, %v2730_v53 }
 0x3b1   :  { %v1396_v44 = vpack.c.bf16 %v1388_v38, %v1388_v38  ;;  %v1397_v41 = vpack.c.bf16 %v1389_v45, %v1389_v45  ;;  %v1398_v48 = vpack.c.bf16 %v1390_v10, %v1390_v10  ;;  %v1399_v11 = vpack.c.bf16 %v1391_v32, %v1391_v32 }
 0x3b2   :  { %v1400_v55 = vpack.c.bf16 %v1392_v51, %v1392_v51  ;;  %v1401_v21 = vpack.c.bf16 %v1393_v7, %v1393_v7  ;;  %v1402_v8 = vpack.c.bf16 %v1394_v19, %v1394_v19  ;;  %v1403_v22 = vpack.c.bf16 %v1395_v20, %v1395_v20 }
 0x3b3   :  { %1412 = vmatmul.bf16.vlgmr.msra.gmra.mxu0 %v1396_v44  ;;  %1425 = vmatmul.bf16.vlgmr.msra.gmra.mxu1 %v1397_v41 }
 0x3b4   :  { %1438 = vmatmul.bf16.vlgmr.msra.gmra.mxu2 %v1398_v48  ;;  %1451 = vmatmul.bf16.vlgmr.msra.gmra.mxu3 %v1399_v11 }
 0x3c3   :  { %1464 = vmatmul.bf16.vlgmr.msrb.gmra.mxu0 %v1400_v55  ;;  %1477 = vmatmul.bf16.vlgmr.msrb.gmra.mxu1 %v1401_v21 }
 0x3c4   :  { %1490 = vmatmul.bf16.vlgmr.msrb.gmra.mxu2 %v1402_v8  ;;  %1503 = vmatmul.bf16.vlgmr.msrb.gmra.mxu3 %v1403_v22 }
 0x430   :  { %v1413_v37 = vpop.f32.mrf.mxu0  ;;  %v1426_v46 = vpop.f32.mrf.mxu1 }
 0x431   :  { %v1427_v14 = vadd.f32 %v1426_v46, %v1413_v37 }
 0x437   :  { %v1439_v5 = vpop.f32.mrf.mxu2  ;;  %v1452_v43 = vpop.f32.mrf.mxu3 }
 0x438   :  { %v1415_v6 = vpop.f32.mrf.mxu0  ;;  %v1428_v39 = vpop.f32.mrf.mxu1  ;;  %v1440_v40 = vadd.f32 %v1439_v5, %v1427_v14 }
 0x43a   :  { %v1453_v50 = vadd.f32 %v1452_v43, %v1440_v40 }
 0x43f   :  { %v1441_v9 = vpop.f32.mrf.mxu2  ;;  %v1454_v4 = vpop.f32.mrf.mxu3 }
 0x440   :  { %v1465_v53 = vpop.f32.mrf.mxu0  ;;  %v1478_v15 = vpop.f32.mrf.mxu1 }
 0x441   :  { %v1466_v47 = vadd.f32 %v1465_v53, %v1453_v50 }
 0x443   :  { %v1479_v54 = vadd.f32 %v1478_v15, %v1466_v47 }
 0x447   :  { %v1491_v49 = vpop.f32.mrf.mxu2  ;;  %v1504_v42 = vpop.f32.mrf.mxu3 }
 0x448   :  { %v1492_v35 = vadd.f32 %v1491_v49, %v1479_v54  ;;  %v1467_v28 = vpop.f32.mrf.mxu0  ;;  %v1480_v52 = vpop.f32.mrf.mxu1 }
 0x44a   :  { %v1505_v56 = vadd.f32 %v1504_v42, %v1492_v35 }
 0x44c   :  { %v1508_v58 = vadd.f32 %v2229_v57, %v1505_v56 }
 0x44e   :  { %1512 = vmax.xlane.f32.xlu2 %v1508_v58 }
 0x44f   :  { %v1493_v59 = vpop.f32.mrf.mxu2  ;;  %v1506_v60 = vpop.f32.mrf.mxu3 }
 0x4c1   :  { %v1513_v61 = vpop.xlane.xlu2 %1512 }
 0x4c2   :  { %v1514_v62 = vsub.f32 %v1508_v58, %v1513_v61 }
 0x4c4   :  { %v1515_v63 = vmul.f32 1.442695, %v1514_v62 }
 0x4c6   :  { %2209 = vpow2.f32 %v1515_v63 }
 0x4c7   :  { %2211 = vlog2.f32 %v2620_v29 }
 0x4cc   :  { %v2210_v0 = vpop.eup %2209 }
 0x4cd   :  { %1517 = vadd.xlane.f32.xlu0 %v2210_v0  ;;  %v2212_v2 = vpop.eup %2211 }
 0x4ce   :  { %v1510_v3 = vmul.f32 0.6931472, %v2212_v2 }
 0x4d0   :  { %v1511_v17 = vsub.f32 %v2812_v16, %v1510_v3 }
 0x540   :  { %v1518_v1 = vpop.xlane.xlu0 %1517 }
 0x541   :  { %2213 = vlog2.f32 %v1518_v1 }
 0x547   :  { %v2214_v12 = vpop.eup %2213 }
 0x548   :  { %v1520_v13 = vmul.f32 0.6931472, %v2214_v12 }
 0x54a   :  { %v1521_v18 = vsub.f32 %v1514_v62, %v1520_v13 }
 0x54c   :  { %v1522_v23 = vsub.f32 %v1511_v17, %v1521_v18 }
 0x54e   :  { %v1523_v24 = vmul.f32 %v1522_v23, %v2644_v36 }
 0x550   :  { %1524 = vst [vmem:[#allocation10] sm:$0xff] %v1523_v24 }
 0x551   :  { %1535 = dma.vmem_to_hbm [thread:$0]  %s1531_s3, 128, %s1533_s13, [#allocation4]  }
 0x552   :  { %2356 = dma.done.wait [#allocation4], 128  }
 0x553   :  { %2357 = vsyncadd [#allocation4], 4294967168 }
 0x554   :  { %1540 = vsyncpa [#allocation3], 1 }
 0x555   :  { %1541 = vsyncpa [#allocation6], 1 }
 0x556   :  { %1542 = vsyncpa [#allocation9], 1 }
 0x557   :  { %1543 = vsyncpa [#allocation4], 1 }

</bundles_post_ra>
